<compile_context>
chip_gen: v6e
topology: v6e:2x2x1
jax: 0.10.0
libtpu: 0.0.40
codegen_flags: <defaults>
</compile_context>

<pallas_src>
import functools

import jax
import jax.numpy as jnp
from jax.experimental import pallas as pl
from jax.experimental.pallas import tpu as pltpu

LANE = 128  # lane-dense padding for the classifier output


# ------------------------------ fused kernel -------------------------------

def _fused_bert_kernel(x_ref, mask_ref,
                       emb_g_ref, emb_b_ref,
                       qkv_w_ref, qkv_b_ref,
                       ao_w_ref, ao_b_ref, aln_g_ref, aln_b_ref,
                       f1_w_ref, f1_b_ref, f2_w_ref, f2_b_ref,
                       fln_g_ref, fln_b_ref,
                       pool_w_ref, pool_b_ref,
                       cls_w_ref, cls_b_ref,
                       out_ref,
                       *, num_layers, num_heads, head_dim, eps):
    """One grid program processes one sequence (rows b*S .. (b+1)*S-1)."""
    hidden = num_heads * head_dim
    scale = 1.0 / float(head_dim) ** 0.5

    def layernorm(x, g, b):
        mean = jnp.mean(x, axis=-1, keepdims=True)
        xc = x - mean
        var = jnp.mean(xc * xc, axis=-1, keepdims=True)
        return (xc * jax.lax.rsqrt(var + eps)) * g + b

    # --- embedding LayerNorm (no residual; embedding dropout = eval identity)
    x = layernorm(x_ref[...], emb_g_ref[...], emb_b_ref[...])        # (S, H)
    madd = mask_ref[0]                                               # (1, S)
    seq = x.shape[0]

    # --- transformer encoder layers (static unroll, weights VMEM-resident) --
    for l in range(num_layers):
        # fused Q|K|V projection: (S, H) @ (H, 3H)
        qkv = jnp.dot(x, qkv_w_ref[l],
                      preferred_element_type=jnp.float32) + qkv_b_ref[l]
        ao_w = ao_w_ref[l]                                           # (H, H)
        # attention with the output projection folded per head
        attn = jnp.zeros((seq, hidden), jnp.float32) + ao_b_ref[l]
        for h in range(num_heads):
            lo = h * head_dim
            q = qkv[:, lo:lo + head_dim]
            k = qkv[:, hidden + lo:hidden + lo + head_dim]
            v = qkv[:, 2 * hidden + lo:2 * hidden + lo + head_dim]
            # contract head_dim of q and k directly (no explicit transpose)
            s = jax.lax.dot_general(
                q, k, (((1,), (1,)), ((), ())),
                preferred_element_type=jnp.float32) * scale           # (S, S)
            s = s + madd
            s = s - jnp.max(s, axis=-1, keepdims=True)
            p = jnp.exp(s)
            p = p * pl.reciprocal(jnp.sum(p, axis=-1, keepdims=True),
                                  approx=True)
            ctx_h = jnp.dot(p, v, preferred_element_type=jnp.float32)  # (S, hd)
            attn = attn + jnp.dot(ctx_h, ao_w[lo:lo + head_dim, :],
                                  preferred_element_type=jnp.float32)
        # attention-output dropout = eval identity; residual + LayerNorm
        x = layernorm(attn + x, aln_g_ref[l], aln_b_ref[l])

        # feed-forward
        inter = jnp.dot(x, f1_w_ref[l],
                        preferred_element_type=jnp.float32) + f1_b_ref[l]
        # TODO(synk): HF BERT uses exact erf-GELU; tanh approximation used here.
        inter = jax.nn.gelu(inter, approximate=True)
        ffn = jnp.dot(inter, f2_w_ref[l],
                      preferred_element_type=jnp.float32) + f2_b_ref[l]
        # FFN-output dropout = eval identity; residual + LayerNorm
        x = layernorm(ffn + x, fln_g_ref[l], fln_b_ref[l])

    # --- BERT pooler on the CLS token (row 0 of this sequence) --------------
    cls_tok = x[0:1, :]                                              # (1, H)
    pooled = jnp.tanh(jnp.dot(cls_tok, pool_w_ref[...],
                              preferred_element_type=jnp.float32)
                      + pool_b_ref[...])
    # --- head: Dropout(p=0.3) is identity in eval; lane-dense classifier ----
    logits = jnp.dot(pooled, cls_w_ref[...],
                     preferred_element_type=jnp.float32) + cls_b_ref[...]
    out_ref[0] = logits.astype(out_ref.dtype)                        # (1, 128)


# ------------------------------ model wiring -------------------------------

class Config:
    vocab = 128
    hidden = 64
    heads = 2
    head_dim = 32          # hidden // heads
    layers = 2
    intermediate = 128
    max_pos = 32
    type_vocab = 2
    n_classes = 3


def init_params(key, cfg):
    keys = iter(jax.random.split(key, 256))

    def nrm(shape):
        return 0.02 * jax.random.normal(next(keys), shape, jnp.float32)

    def zeros(shape):
        return jnp.zeros(shape, jnp.float32)

    def ones(shape):
        return jnp.ones(shape, jnp.float32)

    p = {
        "word_emb": nrm((cfg.vocab, cfg.hidden)),
        "pos_emb": nrm((cfg.max_pos, cfg.hidden)),
        "type_emb": nrm((cfg.type_vocab, cfg.hidden)),
        "emb_ln_g": ones((cfg.hidden,)),
        "emb_ln_b": zeros((cfg.hidden,)),
        "layers": [],
        "pool_w": nrm((cfg.hidden, cfg.hidden)),
        "pool_b": zeros((cfg.hidden,)),
        # nn.Linear(hidden, n_classes): stored pre-transposed as (in, out)
        "cls_w": nrm((cfg.hidden, cfg.n_classes)),
        "cls_b": zeros((cfg.n_classes,)),
    }
    for _ in range(cfg.layers):
        l = {}
        for name in ("q", "k", "v", "attn_out"):
            l[name + "_w"] = nrm((cfg.hidden, cfg.hidden))
            l[name + "_b"] = zeros((cfg.hidden,))
        l["attn_ln_g"] = ones((cfg.hidden,))
        l["attn_ln_b"] = zeros((cfg.hidden,))
        l["ffn1_w"] = nrm((cfg.hidden, cfg.intermediate))
        l["ffn1_b"] = zeros((cfg.intermediate,))
        l["ffn2_w"] = nrm((cfg.intermediate, cfg.hidden))
        l["ffn2_b"] = zeros((cfg.hidden,))
        l["ffn_ln_g"] = ones((cfg.hidden,))
        l["ffn_ln_b"] = zeros((cfg.hidden,))
        p["layers"].append(l)
    return p


def bug_predictor_forward(params, input_ids, attention_mask, cfg):
    B, S = input_ids.shape
    H, nh, hd = cfg.hidden, cfg.heads, cfg.head_dim
    L, I = cfg.layers, cfg.intermediate

    # --- embeddings (table gathers are XLA glue; LN is inside the kernel) ---
    # TODO(synk): token_type_ids assumed all-zero, as in the reference usage.
    x = (params["word_emb"][input_ids]
         + params["pos_emb"][:S][None, :, :]
         + params["type_emb"][0][None, None, :]).reshape(B * S, H)
    # BERT extended attention mask: (1 - mask) * -10000, broadcast over queries
    mask_add = ((1.0 - attention_mask.astype(jnp.float32)) * -10000.0
                ).reshape(B, 1, S)

    # --- pack per-layer weights into stacked, kernel-friendly layouts -------
    layers = params["layers"]
    qkv_w = jnp.stack([jnp.concatenate([l["q_w"], l["k_w"], l["v_w"]], axis=1)
                       for l in layers])                            # (L, H, 3H)
    qkv_b = jnp.stack([jnp.concatenate([l["q_b"], l["k_b"], l["v_b"]])
                       for l in layers]).reshape(L, 1, 3 * H)
    ao_w = jnp.stack([l["attn_out_w"] for l in layers])             # (L, H, H)
    ao_b = jnp.stack([l["attn_out_b"] for l in layers]).reshape(L, 1, H)
    aln_g = jnp.stack([l["attn_ln_g"] for l in layers]).reshape(L, 1, H)
    aln_b = jnp.stack([l["attn_ln_b"] for l in layers]).reshape(L, 1, H)
    f1_w = jnp.stack([l["ffn1_w"] for l in layers])                 # (L, H, I)
    f1_b = jnp.stack([l["ffn1_b"] for l in layers]).reshape(L, 1, I)
    f2_w = jnp.stack([l["ffn2_w"] for l in layers])                 # (L, I, H)
    f2_b = jnp.stack([l["ffn2_b"] for l in layers]).reshape(L, 1, H)
    fln_g = jnp.stack([l["ffn_ln_g"] for l in layers]).reshape(L, 1, H)
    fln_b = jnp.stack([l["ffn_ln_b"] for l in layers]).reshape(L, 1, H)

    # lane-dense classifier: pad (H, n_classes) -> (H, 128), slice outside
    cls_w_pad = jnp.zeros((H, LANE), jnp.float32
                          ).at[:, :cfg.n_classes].set(params["cls_w"])
    cls_b_pad = jnp.zeros((1, LANE), jnp.float32
                          ).at[0, :cfg.n_classes].set(params["cls_b"])

    def full(shape):
        return pl.BlockSpec(shape, lambda b, _s=shape: (0,) * len(_s))

    kernel = functools.partial(_fused_bert_kernel, num_layers=L, num_heads=nh,
                               head_dim=hd, eps=1e-12)
    out_padded = pl.pallas_call(
        kernel,
        out_shape=jax.ShapeDtypeStruct((B, 1, LANE), jnp.float32),
        grid=(B,),
        in_specs=[
            pl.BlockSpec((S, H), lambda b: (b, 0)),        # x rows of batch b
            pl.BlockSpec((1, 1, S), lambda b: (b, 0, 0)),  # additive mask
            full((1, H)), full((1, H)),                    # embedding LN
            full((L, H, 3 * H)), full((L, 1, 3 * H)),      # fused QKV
            full((L, H, H)), full((L, 1, H)),              # attn out proj
            full((L, 1, H)), full((L, 1, H)),              # attn LN
            full((L, H, I)), full((L, 1, I)),              # ffn1
            full((L, I, H)), full((L, 1, H)),              # ffn2
            full((L, 1, H)), full((L, 1, H)),              # ffn LN
            full((H, H)), full((1, H)),                    # pooler
            full((H, LANE)), full((1, LANE)),              # classifier (padded)
        ],
        out_specs=pl.BlockSpec((1, 1, LANE), lambda b: (b, 0, 0)),
        compiler_params=pltpu.CompilerParams(
            dimension_semantics=("parallel",)),
    )(x, mask_add,
      params["emb_ln_g"].reshape(1, H), params["emb_ln_b"].reshape(1, H),
      qkv_w, qkv_b, ao_w, ao_b, aln_g, aln_b,
      f1_w, f1_b, f2_w, f2_b, fln_g, fln_b,
      params["pool_w"], params["pool_b"].reshape(1, H),
      cls_w_pad, cls_b_pad)

    return out_padded.reshape(B, LANE)[:, :cfg.n_classes]


if __name__ == "__main__":
    cfg = Config()
    key = jax.random.PRNGKey(0)
    pkey, ikey = jax.random.split(key)
    params = init_params(pkey, cfg)

    B, S = 2, 8
    input_ids = jax.random.randint(ikey, (B, S), 0, cfg.vocab, dtype=jnp.int32)
    attention_mask = jnp.array([[1, 1, 1, 1, 1, 1, 0, 0],
                                [1, 1, 1, 1, 0, 0, 0, 0]], dtype=jnp.int32)

    @jax.jit
    def forward(p, ids, mask):
        return bug_predictor_forward(p, ids, mask, cfg)

    logits = jax.block_until_ready(forward(params, input_ids, attention_mask))
    assert logits.shape == (B, cfg.n_classes)
    assert bool(jnp.all(jnp.isfinite(logits)))
    print("KERNEL_OK")
</pallas_src>

<mosaic_0001>
module attributes {stable_mosaic.version = 11 : i64} {
  func.func @_fused_bert_kernel(%arg0: i32, %arg1: memref<8x64xf32, #tpu.memory_space<vmem>>, %arg2: memref<1x1x8xf32, #tpu.memory_space<vmem>>, %arg3: memref<1x64xf32, #tpu.memory_space<vmem>>, %arg4: memref<1x64xf32, #tpu.memory_space<vmem>>, %arg5: memref<2x64x192xf32, #tpu.memory_space<vmem>>, %arg6: memref<2x1x192xf32, #tpu.memory_space<vmem>>, %arg7: memref<2x64x64xf32, #tpu.memory_space<vmem>>, %arg8: memref<2x1x64xf32, #tpu.memory_space<vmem>>, %arg9: memref<2x1x64xf32, #tpu.memory_space<vmem>>, %arg10: memref<2x1x64xf32, #tpu.memory_space<vmem>>, %arg11: memref<2x64x128xf32, #tpu.memory_space<vmem>>, %arg12: memref<2x1x128xf32, #tpu.memory_space<vmem>>, %arg13: memref<2x128x64xf32, #tpu.memory_space<vmem>>, %arg14: memref<2x1x64xf32, #tpu.memory_space<vmem>>, %arg15: memref<2x1x64xf32, #tpu.memory_space<vmem>>, %arg16: memref<2x1x64xf32, #tpu.memory_space<vmem>>, %arg17: memref<64x64xf32, #tpu.memory_space<vmem>>, %arg18: memref<1x64xf32, #tpu.memory_space<vmem>>, %arg19: memref<64x128xf32, #tpu.memory_space<vmem>>, %arg20: memref<1x128xf32, #tpu.memory_space<vmem>>, %arg21: memref<1x1x128xf32, #tpu.memory_space<vmem>>) attributes {dimension_semantics = [#tpu.dimension_semantics<parallel>], iteration_bounds = array<i64: 2>, scalar_prefetch = 0 : i64, scratch_operands = 0 : i64, tpu.core_type = #tpu.core_type<tc>, window_params = [{transform_indices = @transform_0, window_bounds = array<i64: 8, 64>}, {transform_indices = @transform_1, window_bounds = array<i64: 1, 1, 8>}, {pipeline_mode = #tpu.pipeline_mode<synchronous>, transform_indices = @transform_2, window_bounds = array<i64: 1, 64>}, {pipeline_mode = #tpu.pipeline_mode<synchronous>, transform_indices = @transform_3, window_bounds = array<i64: 1, 64>}, {pipeline_mode = #tpu.pipeline_mode<synchronous>, transform_indices = @transform_4, window_bounds = array<i64: 2, 64, 192>}, {pipeline_mode = #tpu.pipeline_mode<synchronous>, transform_indices = @transform_5, window_bounds = array<i64: 2, 1, 192>}, {pipeline_mode = #tpu.pipeline_mode<synchronous>, transform_indices = @transform_6, window_bounds = array<i64: 2, 64, 64>}, {pipeline_mode = #tpu.pipeline_mode<synchronous>, transform_indices = @transform_7, window_bounds = array<i64: 2, 1, 64>}, {pipeline_mode = #tpu.pipeline_mode<synchronous>, transform_indices = @transform_8, window_bounds = array<i64: 2, 1, 64>}, {pipeline_mode = #tpu.pipeline_mode<synchronous>, transform_indices = @transform_9, window_bounds = array<i64: 2, 1, 64>}, {pipeline_mode = #tpu.pipeline_mode<synchronous>, transform_indices = @transform_10, window_bounds = array<i64: 2, 64, 128>}, {pipeline_mode = #tpu.pipeline_mode<synchronous>, transform_indices = @transform_11, window_bounds = array<i64: 2, 1, 128>}, {pipeline_mode = #tpu.pipeline_mode<synchronous>, transform_indices = @transform_12, window_bounds = array<i64: 2, 128, 64>}, {pipeline_mode = #tpu.pipeline_mode<synchronous>, transform_indices = @transform_13, window_bounds = array<i64: 2, 1, 64>}, {pipeline_mode = #tpu.pipeline_mode<synchronous>, transform_indices = @transform_14, window_bounds = array<i64: 2, 1, 64>}, {pipeline_mode = #tpu.pipeline_mode<synchronous>, transform_indices = @transform_15, window_bounds = array<i64: 2, 1, 64>}, {pipeline_mode = #tpu.pipeline_mode<synchronous>, transform_indices = @transform_16, window_bounds = array<i64: 64, 64>}, {pipeline_mode = #tpu.pipeline_mode<synchronous>, transform_indices = @transform_17, window_bounds = array<i64: 1, 64>}, {pipeline_mode = #tpu.pipeline_mode<synchronous>, transform_indices = @transform_18, window_bounds = array<i64: 64, 128>}, {pipeline_mode = #tpu.pipeline_mode<synchronous>, transform_indices = @transform_19, window_bounds = array<i64: 1, 128>}, {transform_indices = @transform_20, window_bounds = array<i64: 1, 1, 128>}]} {
    %c0 = arith.constant 0 : index
    %c0_0 = arith.constant 0 : index
    %0 = vector.load %arg1[%c0, %c0_0] : memref<8x64xf32, #tpu.memory_space<vmem>>, vector<8x64xf32>
    %c0_1 = arith.constant 0 : index
    %c0_2 = arith.constant 0 : index
    %1 = vector.load %arg3[%c0_1, %c0_2] : memref<1x64xf32, #tpu.memory_space<vmem>>, vector<1x64xf32>
    %c0_3 = arith.constant 0 : index
    %c0_4 = arith.constant 0 : index
    %2 = vector.load %arg4[%c0_3, %c0_4] : memref<1x64xf32, #tpu.memory_space<vmem>>, vector<1x64xf32>
    %cst = arith.constant dense<0.000000e+00> : vector<8xf32>
    %3 = vector.multi_reduction <add>, %0, %cst [1] : vector<8x64xf32> to vector<8xf32>
    %4 = vector.shape_cast %3 : vector<8xf32> to vector<8x1xf32>
    %cst_5 = arith.constant 6.400000e+01 : f32
    %5 = vector.broadcast %cst_5 : f32 to vector<8x1xf32>
    %6 = arith.divf %4, %5 : vector<8x1xf32>
    %7 = vector.broadcast %6 : vector<8x1xf32> to vector<8x64xf32>
    %8 = arith.subf %0, %7 : vector<8x64xf32>
    %9 = arith.mulf %8, %8 : vector<8x64xf32>
    %cst_6 = arith.constant dense<0.000000e+00> : vector<8xf32>
    %10 = vector.multi_reduction <add>, %9, %cst_6 [1] : vector<8x64xf32> to vector<8xf32>
    %11 = vector.shape_cast %10 : vector<8xf32> to vector<8x1xf32>
    %cst_7 = arith.constant 6.400000e+01 : f32
    %12 = vector.broadcast %cst_7 : f32 to vector<8x1xf32>
    %13 = arith.divf %11, %12 : vector<8x1xf32>
    %cst_8 = arith.constant 9.99999996E-13 : f32
    %14 = vector.broadcast %cst_8 : f32 to vector<8x1xf32>
    %15 = arith.addf %13, %14 : vector<8x1xf32>
    %16 = math.rsqrt %15 : vector<8x1xf32>
    %17 = vector.broadcast %16 : vector<8x1xf32> to vector<8x64xf32>
    %18 = arith.mulf %8, %17 : vector<8x64xf32>
    %19 = vector.broadcast %1 : vector<1x64xf32> to vector<8x64xf32>
    %20 = arith.mulf %18, %19 : vector<8x64xf32>
    %21 = vector.broadcast %2 : vector<1x64xf32> to vector<8x64xf32>
    %22 = arith.addf %20, %21 : vector<8x64xf32>
    %c0_9 = arith.constant 0 : index
    %c0_10 = arith.constant 0 : index
    %c0_11 = arith.constant 0 : index
    %23 = vector.load %arg2[%c0_9, %c0_10, %c0_11] : memref<1x1x8xf32, #tpu.memory_space<vmem>>, vector<1x1x8xf32>
    %24 = vector.shape_cast %23 : vector<1x1x8xf32> to vector<1x8xf32>
    %c0_12 = arith.constant 0 : index
    %c0_13 = arith.constant 0 : index
    %c0_14 = arith.constant 0 : index
    %25 = vector.load %arg5[%c0_12, %c0_13, %c0_14] : memref<2x64x192xf32, #tpu.memory_space<vmem>>, vector<1x64x192xf32>
    %26 = vector.shape_cast %25 : vector<1x64x192xf32> to vector<64x192xf32>
    %cst_15 = arith.constant dense<0.000000e+00> : vector<8x192xf32>
    %27 = tpu.matmul %22, %26, %cst_15 {dimension_numbers = #tpu.dot_dimension_numbers<[1], [0], [0], [1], [0, 0, 1, 1], [], []>} : vector<8x64xf32>, vector<64x192xf32>, vector<8x192xf32> -> vector<8x192xf32>
    %c0_16 = arith.constant 0 : index
    %c0_17 = arith.constant 0 : index
    %c0_18 = arith.constant 0 : index
    %28 = vector.load %arg6[%c0_16, %c0_17, %c0_18] : memref<2x1x192xf32, #tpu.memory_space<vmem>>, vector<1x1x192xf32>
    %29 = vector.shape_cast %28 : vector<1x1x192xf32> to vector<1x192xf32>
    %30 = vector.broadcast %29 : vector<1x192xf32> to vector<8x192xf32>
    %31 = arith.addf %27, %30 : vector<8x192xf32>
    %c0_19 = arith.constant 0 : index
    %c0_20 = arith.constant 0 : index
    %c0_21 = arith.constant 0 : index
    %32 = vector.load %arg7[%c0_19, %c0_20, %c0_21] : memref<2x64x64xf32, #tpu.memory_space<vmem>>, vector<1x64x64xf32>
    %33 = vector.shape_cast %32 : vector<1x64x64xf32> to vector<64x64xf32>
    %cst_22 = arith.constant 0.000000e+00 : f32
    %34 = vector.broadcast %cst_22 : f32 to vector<8x64xf32>
    %c0_23 = arith.constant 0 : index
    %c0_24 = arith.constant 0 : index
    %c0_25 = arith.constant 0 : index
    %35 = vector.load %arg8[%c0_23, %c0_24, %c0_25] : memref<2x1x64xf32, #tpu.memory_space<vmem>>, vector<1x1x64xf32>
    %36 = vector.shape_cast %35 : vector<1x1x64xf32> to vector<1x64xf32>
    %37 = vector.broadcast %36 : vector<1x64xf32> to vector<8x64xf32>
    %38 = arith.addf %34, %37 : vector<8x64xf32>
    %39 = vector.extract_strided_slice %31 {offsets = [0, 0], sizes = [8, 32], strides = [1, 1]} : vector<8x192xf32> to vector<8x32xf32>
    %40 = vector.extract_strided_slice %31 {offsets = [0, 64], sizes = [8, 32], strides = [1, 1]} : vector<8x192xf32> to vector<8x32xf32>
    %41 = vector.extract_strided_slice %31 {offsets = [0, 128], sizes = [8, 32], strides = [1, 1]} : vector<8x192xf32> to vector<8x32xf32>
    %cst_26 = arith.constant dense<0.000000e+00> : vector<8x8xf32>
    %42 = tpu.matmul %39, %40, %cst_26 {dimension_numbers = #tpu.dot_dimension_numbers<[1], [1], [0], [0], [0, 0, 1, 0], [], []>} : vector<8x32xf32>, vector<8x32xf32>, vector<8x8xf32> -> vector<8x8xf32>
    %cst_27 = arith.constant 0.176776692 : f32
    %43 = vector.broadcast %cst_27 : f32 to vector<8x8xf32>
    %44 = arith.mulf %42, %43 : vector<8x8xf32>
    %45 = vector.broadcast %24 : vector<1x8xf32> to vector<8x8xf32>
    %46 = arith.addf %44, %45 : vector<8x8xf32>
    %cst_28 = arith.constant dense<0xFF800000> : vector<8xf32>
    %47 = vector.multi_reduction <maximumf>, %46, %cst_28 [1] : vector<8x8xf32> to vector<8xf32>
    %48 = vector.shape_cast %47 : vector<8xf32> to vector<8x1xf32>
    %49 = vector.broadcast %48 : vector<8x1xf32> to vector<8x8xf32>
    %50 = arith.subf %46, %49 : vector<8x8xf32>
    %51 = math.exp %50 : vector<8x8xf32>
    %cst_29 = arith.constant dense<0.000000e+00> : vector<8xf32>
    %52 = vector.multi_reduction <add>, %51, %cst_29 [1] : vector<8x8xf32> to vector<8xf32>
    %53 = vector.shape_cast %52 : vector<8xf32> to vector<8x1xf32>
    %54 = tpu.reciprocal %53 {approx = true} : vector<8x1xf32> -> vector<8x1xf32>
    %55 = vector.broadcast %54 : vector<8x1xf32> to vector<8x8xf32>
    %56 = arith.mulf %51, %55 : vector<8x8xf32>
    %cst_30 = arith.constant dense<0.000000e+00> : vector<8x32xf32>
    %57 = tpu.matmul %56, %41, %cst_30 {dimension_numbers = #tpu.dot_dimension_numbers<[1], [0], [0], [1], [0, 0, 1, 1], [], []>} : vector<8x8xf32>, vector<8x32xf32>, vector<8x32xf32> -> vector<8x32xf32>
    %58 = vector.extract_strided_slice %33 {offsets = [0, 0], sizes = [32, 64], strides = [1, 1]} : vector<64x64xf32> to vector<32x64xf32>
    %cst_31 = arith.constant dense<0.000000e+00> : vector<8x64xf32>
    %59 = tpu.matmul %57, %58, %cst_31 {dimension_numbers = #tpu.dot_dimension_numbers<[1], [0], [0], [1], [0, 0, 1, 1], [], []>} : vector<8x32xf32>, vector<32x64xf32>, vector<8x64xf32> -> vector<8x64xf32>
    %60 = arith.addf %38, %59 : vector<8x64xf32>
    %61 = vector.extract_strided_slice %31 {offsets = [0, 32], sizes = [8, 32], strides = [1, 1]} : vector<8x192xf32> to vector<8x32xf32>
    %62 = vector.extract_strided_slice %31 {offsets = [0, 96], sizes = [8, 32], strides = [1, 1]} : vector<8x192xf32> to vector<8x32xf32>
    %63 = vector.extract_strided_slice %31 {offsets = [0, 160], sizes = [8, 32], strides = [1, 1]} : vector<8x192xf32> to vector<8x32xf32>
    %cst_32 = arith.constant dense<0.000000e+00> : vector<8x8xf32>
    %64 = tpu.matmul %61, %62, %cst_32 {dimension_numbers = #tpu.dot_dimension_numbers<[1], [1], [0], [0], [0, 0, 1, 0], [], []>} : vector<8x32xf32>, vector<8x32xf32>, vector<8x8xf32> -> vector<8x8xf32>
    %cst_33 = arith.constant 0.176776692 : f32
    %65 = vector.broadcast %cst_33 : f32 to vector<8x8xf32>
    %66 = arith.mulf %64, %65 : vector<8x8xf32>
    %67 = vector.broadcast %24 : vector<1x8xf32> to vector<8x8xf32>
    %68 = arith.addf %66, %67 : vector<8x8xf32>
    %cst_34 = arith.constant dense<0xFF800000> : vector<8xf32>
    %69 = vector.multi_reduction <maximumf>, %68, %cst_34 [1] : vector<8x8xf32> to vector<8xf32>
    %70 = vector.shape_cast %69 : vector<8xf32> to vector<8x1xf32>
    %71 = vector.broadcast %70 : vector<8x1xf32> to vector<8x8xf32>
    %72 = arith.subf %68, %71 : vector<8x8xf32>
    %73 = math.exp %72 : vector<8x8xf32>
    %cst_35 = arith.constant dense<0.000000e+00> : vector<8xf32>
    %74 = vector.multi_reduction <add>, %73, %cst_35 [1] : vector<8x8xf32> to vector<8xf32>
    %75 = vector.shape_cast %74 : vector<8xf32> to vector<8x1xf32>
    %76 = tpu.reciprocal %75 {approx = true} : vector<8x1xf32> -> vector<8x1xf32>
    %77 = vector.broadcast %76 : vector<8x1xf32> to vector<8x8xf32>
    %78 = arith.mulf %73, %77 : vector<8x8xf32>
    %cst_36 = arith.constant dense<0.000000e+00> : vector<8x32xf32>
    %79 = tpu.matmul %78, %63, %cst_36 {dimension_numbers = #tpu.dot_dimension_numbers<[1], [0], [0], [1], [0, 0, 1, 1], [], []>} : vector<8x8xf32>, vector<8x32xf32>, vector<8x32xf32> -> vector<8x32xf32>
    %80 = vector.extract_strided_slice %33 {offsets = [32, 0], sizes = [32, 64], strides = [1, 1]} : vector<64x64xf32> to vector<32x64xf32>
    %cst_37 = arith.constant dense<0.000000e+00> : vector<8x64xf32>
    %81 = tpu.matmul %79, %80, %cst_37 {dimension_numbers = #tpu.dot_dimension_numbers<[1], [0], [0], [1], [0, 0, 1, 1], [], []>} : vector<8x32xf32>, vector<32x64xf32>, vector<8x64xf32> -> vector<8x64xf32>
    %82 = arith.addf %60, %81 : vector<8x64xf32>
    %83 = arith.addf %82, %22 : vector<8x64xf32>
    %c0_38 = arith.constant 0 : index
    %c0_39 = arith.constant 0 : index
    %c0_40 = arith.constant 0 : index
    %84 = vector.load %arg9[%c0_38, %c0_39, %c0_40] : memref<2x1x64xf32, #tpu.memory_space<vmem>>, vector<1x1x64xf32>
    %85 = vector.shape_cast %84 : vector<1x1x64xf32> to vector<1x64xf32>
    %c0_41 = arith.constant 0 : index
    %c0_42 = arith.constant 0 : index
    %c0_43 = arith.constant 0 : index
    %86 = vector.load %arg10[%c0_41, %c0_42, %c0_43] : memref<2x1x64xf32, #tpu.memory_space<vmem>>, vector<1x1x64xf32>
    %87 = vector.shape_cast %86 : vector<1x1x64xf32> to vector<1x64xf32>
    %cst_44 = arith.constant dense<0.000000e+00> : vector<8xf32>
    %88 = vector.multi_reduction <add>, %83, %cst_44 [1] : vector<8x64xf32> to vector<8xf32>
    %89 = vector.shape_cast %88 : vector<8xf32> to vector<8x1xf32>
    %cst_45 = arith.constant 6.400000e+01 : f32
    %90 = vector.broadcast %cst_45 : f32 to vector<8x1xf32>
    %91 = arith.divf %89, %90 : vector<8x1xf32>
    %92 = vector.broadcast %91 : vector<8x1xf32> to vector<8x64xf32>
    %93 = arith.subf %83, %92 : vector<8x64xf32>
    %94 = arith.mulf %93, %93 : vector<8x64xf32>
    %cst_46 = arith.constant dense<0.000000e+00> : vector<8xf32>
    %95 = vector.multi_reduction <add>, %94, %cst_46 [1] : vector<8x64xf32> to vector<8xf32>
    %96 = vector.shape_cast %95 : vector<8xf32> to vector<8x1xf32>
    %cst_47 = arith.constant 6.400000e+01 : f32
    %97 = vector.broadcast %cst_47 : f32 to vector<8x1xf32>
    %98 = arith.divf %96, %97 : vector<8x1xf32>
    %cst_48 = arith.constant 9.99999996E-13 : f32
    %99 = vector.broadcast %cst_48 : f32 to vector<8x1xf32>
    %100 = arith.addf %98, %99 : vector<8x1xf32>
    %101 = math.rsqrt %100 : vector<8x1xf32>
    %102 = vector.broadcast %101 : vector<8x1xf32> to vector<8x64xf32>
    %103 = arith.mulf %93, %102 : vector<8x64xf32>
    %104 = vector.broadcast %85 : vector<1x64xf32> to vector<8x64xf32>
    %105 = arith.mulf %103, %104 : vector<8x64xf32>
    %106 = vector.broadcast %87 : vector<1x64xf32> to vector<8x64xf32>
    %107 = arith.addf %105, %106 : vector<8x64xf32>
    %c0_49 = arith.constant 0 : index
    %c0_50 = arith.constant 0 : index
    %c0_51 = arith.constant 0 : index
    %108 = vector.load %arg11[%c0_49, %c0_50, %c0_51] : memref<2x64x128xf32, #tpu.memory_space<vmem>>, vector<1x64x128xf32>
    %109 = vector.shape_cast %108 : vector<1x64x128xf32> to vector<64x128xf32>
    %cst_52 = arith.constant dense<0.000000e+00> : vector<8x128xf32>
    %110 = tpu.matmul %107, %109, %cst_52 {dimension_numbers = #tpu.dot_dimension_numbers<[1], [0], [0], [1], [0, 0, 1, 1], [], []>} : vector<8x64xf32>, vector<64x128xf32>, vector<8x128xf32> -> vector<8x128xf32>
    %c0_53 = arith.constant 0 : index
    %c0_54 = arith.constant 0 : index
    %c0_55 = arith.constant 0 : index
    %111 = vector.load %arg12[%c0_53, %c0_54, %c0_55] : memref<2x1x128xf32, #tpu.memory_space<vmem>>, vector<1x1x128xf32>
    %112 = vector.shape_cast %111 : vector<1x1x128xf32> to vector<1x128xf32>
    %113 = vector.broadcast %112 : vector<1x128xf32> to vector<8x128xf32>
    %114 = arith.addf %110, %113 : vector<8x128xf32>
    %115 = arith.mulf %114, %114 : vector<8x128xf32>
    %116 = arith.mulf %114, %115 : vector<8x128xf32>
    %cst_56 = arith.constant 4.471500e-02 : f32
    %117 = vector.broadcast %cst_56 : f32 to vector<8x128xf32>
    %118 = arith.mulf %117, %116 : vector<8x128xf32>
    %119 = arith.addf %114, %118 : vector<8x128xf32>
    %cst_57 = arith.constant 0.797884583 : f32
    %120 = vector.broadcast %cst_57 : f32 to vector<8x128xf32>
    %121 = arith.mulf %120, %119 : vector<8x128xf32>
    %122 = math.tanh %121 : vector<8x128xf32>
    %cst_58 = arith.constant 1.000000e+00 : f32
    %123 = vector.broadcast %cst_58 : f32 to vector<8x128xf32>
    %124 = arith.addf %123, %122 : vector<8x128xf32>
    %cst_59 = arith.constant 5.000000e-01 : f32
    %125 = vector.broadcast %cst_59 : f32 to vector<8x128xf32>
    %126 = arith.mulf %125, %124 : vector<8x128xf32>
    %127 = arith.mulf %114, %126 : vector<8x128xf32>
    %c0_60 = arith.constant 0 : index
    %c0_61 = arith.constant 0 : index
    %c0_62 = arith.constant 0 : index
    %128 = vector.load %arg13[%c0_60, %c0_61, %c0_62] : memref<2x128x64xf32, #tpu.memory_space<vmem>>, vector<1x128x64xf32>
    %129 = vector.shape_cast %128 : vector<1x128x64xf32> to vector<128x64xf32>
    %cst_63 = arith.constant dense<0.000000e+00> : vector<8x64xf32>
    %130 = tpu.matmul %127, %129, %cst_63 {dimension_numbers = #tpu.dot_dimension_numbers<[1], [0], [0], [1], [0, 0, 1, 1], [], []>} : vector<8x128xf32>, vector<128x64xf32>, vector<8x64xf32> -> vector<8x64xf32>
    %c0_64 = arith.constant 0 : index
    %c0_65 = arith.constant 0 : index
    %c0_66 = arith.constant 0 : index
    %131 = vector.load %arg14[%c0_64, %c0_65, %c0_66] : memref<2x1x64xf32, #tpu.memory_space<vmem>>, vector<1x1x64xf32>
    %132 = vector.shape_cast %131 : vector<1x1x64xf32> to vector<1x64xf32>
    %133 = vector.broadcast %132 : vector<1x64xf32> to vector<8x64xf32>
    %134 = arith.addf %130, %133 : vector<8x64xf32>
    %135 = arith.addf %134, %107 : vector<8x64xf32>
    %c0_67 = arith.constant 0 : index
    %c0_68 = arith.constant 0 : index
    %c0_69 = arith.constant 0 : index
    %136 = vector.load %arg15[%c0_67, %c0_68, %c0_69] : memref<2x1x64xf32, #tpu.memory_space<vmem>>, vector<1x1x64xf32>
    %137 = vector.shape_cast %136 : vector<1x1x64xf32> to vector<1x64xf32>
    %c0_70 = arith.constant 0 : index
    %c0_71 = arith.constant 0 : index
    %c0_72 = arith.constant 0 : index
    %138 = vector.load %arg16[%c0_70, %c0_71, %c0_72] : memref<2x1x64xf32, #tpu.memory_space<vmem>>, vector<1x1x64xf32>
    %139 = vector.shape_cast %138 : vector<1x1x64xf32> to vector<1x64xf32>
    %cst_73 = arith.constant dense<0.000000e+00> : vector<8xf32>
    %140 = vector.multi_reduction <add>, %135, %cst_73 [1] : vector<8x64xf32> to vector<8xf32>
    %141 = vector.shape_cast %140 : vector<8xf32> to vector<8x1xf32>
    %cst_74 = arith.constant 6.400000e+01 : f32
    %142 = vector.broadcast %cst_74 : f32 to vector<8x1xf32>
    %143 = arith.divf %141, %142 : vector<8x1xf32>
    %144 = vector.broadcast %143 : vector<8x1xf32> to vector<8x64xf32>
    %145 = arith.subf %135, %144 : vector<8x64xf32>
    %146 = arith.mulf %145, %145 : vector<8x64xf32>
    %cst_75 = arith.constant dense<0.000000e+00> : vector<8xf32>
    %147 = vector.multi_reduction <add>, %146, %cst_75 [1] : vector<8x64xf32> to vector<8xf32>
    %148 = vector.shape_cast %147 : vector<8xf32> to vector<8x1xf32>
    %cst_76 = arith.constant 6.400000e+01 : f32
    %149 = vector.broadcast %cst_76 : f32 to vector<8x1xf32>
    %150 = arith.divf %148, %149 : vector<8x1xf32>
    %cst_77 = arith.constant 9.99999996E-13 : f32
    %151 = vector.broadcast %cst_77 : f32 to vector<8x1xf32>
    %152 = arith.addf %150, %151 : vector<8x1xf32>
    %153 = math.rsqrt %152 : vector<8x1xf32>
    %154 = vector.broadcast %153 : vector<8x1xf32> to vector<8x64xf32>
    %155 = arith.mulf %145, %154 : vector<8x64xf32>
    %156 = vector.broadcast %137 : vector<1x64xf32> to vector<8x64xf32>
    %157 = arith.mulf %155, %156 : vector<8x64xf32>
    %158 = vector.broadcast %139 : vector<1x64xf32> to vector<8x64xf32>
    %159 = arith.addf %157, %158 : vector<8x64xf32>
    %c1 = arith.constant 1 : index
    %c0_78 = arith.constant 0 : index
    %c0_79 = arith.constant 0 : index
    %160 = vector.load %arg5[%c1, %c0_78, %c0_79] : memref<2x64x192xf32, #tpu.memory_space<vmem>>, vector<1x64x192xf32>
    %161 = vector.shape_cast %160 : vector<1x64x192xf32> to vector<64x192xf32>
    %cst_80 = arith.constant dense<0.000000e+00> : vector<8x192xf32>
    %162 = tpu.matmul %159, %161, %cst_80 {dimension_numbers = #tpu.dot_dimension_numbers<[1], [0], [0], [1], [0, 0, 1, 1], [], []>} : vector<8x64xf32>, vector<64x192xf32>, vector<8x192xf32> -> vector<8x192xf32>
    %c1_81 = arith.constant 1 : index
    %c0_82 = arith.constant 0 : index
    %c0_83 = arith.constant 0 : index
    %163 = vector.load %arg6[%c1_81, %c0_82, %c0_83] : memref<2x1x192xf32, #tpu.memory_space<vmem>>, vector<1x1x192xf32>
    %164 = vector.shape_cast %163 : vector<1x1x192xf32> to vector<1x192xf32>
    %165 = vector.broadcast %164 : vector<1x192xf32> to vector<8x192xf32>
    %166 = arith.addf %162, %165 : vector<8x192xf32>
    %c1_84 = arith.constant 1 : index
    %c0_85 = arith.constant 0 : index
    %c0_86 = arith.constant 0 : index
    %167 = vector.load %arg7[%c1_84, %c0_85, %c0_86] : memref<2x64x64xf32, #tpu.memory_space<vmem>>, vector<1x64x64xf32>
    %168 = vector.shape_cast %167 : vector<1x64x64xf32> to vector<64x64xf32>
    %cst_87 = arith.constant 0.000000e+00 : f32
    %169 = vector.broadcast %cst_87 : f32 to vector<8x64xf32>
    %c1_88 = arith.constant 1 : index
    %c0_89 = arith.constant 0 : index
    %c0_90 = arith.constant 0 : index
    %170 = vector.load %arg8[%c1_88, %c0_89, %c0_90] : memref<2x1x64xf32, #tpu.memory_space<vmem>>, vector<1x1x64xf32>
    %171 = vector.shape_cast %170 : vector<1x1x64xf32> to vector<1x64xf32>
    %172 = vector.broadcast %171 : vector<1x64xf32> to vector<8x64xf32>
    %173 = arith.addf %169, %172 : vector<8x64xf32>
    %174 = vector.extract_strided_slice %166 {offsets = [0, 0], sizes = [8, 32], strides = [1, 1]} : vector<8x192xf32> to vector<8x32xf32>
    %175 = vector.extract_strided_slice %166 {offsets = [0, 64], sizes = [8, 32], strides = [1, 1]} : vector<8x192xf32> to vector<8x32xf32>
    %176 = vector.extract_strided_slice %166 {offsets = [0, 128], sizes = [8, 32], strides = [1, 1]} : vector<8x192xf32> to vector<8x32xf32>
    %cst_91 = arith.constant dense<0.000000e+00> : vector<8x8xf32>
    %177 = tpu.matmul %174, %175, %cst_91 {dimension_numbers = #tpu.dot_dimension_numbers<[1], [1], [0], [0], [0, 0, 1, 0], [], []>} : vector<8x32xf32>, vector<8x32xf32>, vector<8x8xf32> -> vector<8x8xf32>
    %cst_92 = arith.constant 0.176776692 : f32
    %178 = vector.broadcast %cst_92 : f32 to vector<8x8xf32>
    %179 = arith.mulf %177, %178 : vector<8x8xf32>
    %180 = vector.broadcast %24 : vector<1x8xf32> to vector<8x8xf32>
    %181 = arith.addf %179, %180 : vector<8x8xf32>
    %cst_93 = arith.constant dense<0xFF800000> : vector<8xf32>
    %182 = vector.multi_reduction <maximumf>, %181, %cst_93 [1] : vector<8x8xf32> to vector<8xf32>
    %183 = vector.shape_cast %182 : vector<8xf32> to vector<8x1xf32>
    %184 = vector.broadcast %183 : vector<8x1xf32> to vector<8x8xf32>
    %185 = arith.subf %181, %184 : vector<8x8xf32>
    %186 = math.exp %185 : vector<8x8xf32>
    %cst_94 = arith.constant dense<0.000000e+00> : vector<8xf32>
    %187 = vector.multi_reduction <add>, %186, %cst_94 [1] : vector<8x8xf32> to vector<8xf32>
    %188 = vector.shape_cast %187 : vector<8xf32> to vector<8x1xf32>
    %189 = tpu.reciprocal %188 {approx = true} : vector<8x1xf32> -> vector<8x1xf32>
    %190 = vector.broadcast %189 : vector<8x1xf32> to vector<8x8xf32>
    %191 = arith.mulf %186, %190 : vector<8x8xf32>
    %cst_95 = arith.constant dense<0.000000e+00> : vector<8x32xf32>
    %192 = tpu.matmul %191, %176, %cst_95 {dimension_numbers = #tpu.dot_dimension_numbers<[1], [0], [0], [1], [0, 0, 1, 1], [], []>} : vector<8x8xf32>, vector<8x32xf32>, vector<8x32xf32> -> vector<8x32xf32>
    %193 = vector.extract_strided_slice %168 {offsets = [0, 0], sizes = [32, 64], strides = [1, 1]} : vector<64x64xf32> to vector<32x64xf32>
    %cst_96 = arith.constant dense<0.000000e+00> : vector<8x64xf32>
    %194 = tpu.matmul %192, %193, %cst_96 {dimension_numbers = #tpu.dot_dimension_numbers<[1], [0], [0], [1], [0, 0, 1, 1], [], []>} : vector<8x32xf32>, vector<32x64xf32>, vector<8x64xf32> -> vector<8x64xf32>
    %195 = arith.addf %173, %194 : vector<8x64xf32>
    %196 = vector.extract_strided_slice %166 {offsets = [0, 32], sizes = [8, 32], strides = [1, 1]} : vector<8x192xf32> to vector<8x32xf32>
    %197 = vector.extract_strided_slice %166 {offsets = [0, 96], sizes = [8, 32], strides = [1, 1]} : vector<8x192xf32> to vector<8x32xf32>
    %198 = vector.extract_strided_slice %166 {offsets = [0, 160], sizes = [8, 32], strides = [1, 1]} : vector<8x192xf32> to vector<8x32xf32>
    %cst_97 = arith.constant dense<0.000000e+00> : vector<8x8xf32>
    %199 = tpu.matmul %196, %197, %cst_97 {dimension_numbers = #tpu.dot_dimension_numbers<[1], [1], [0], [0], [0, 0, 1, 0], [], []>} : vector<8x32xf32>, vector<8x32xf32>, vector<8x8xf32> -> vector<8x8xf32>
    %cst_98 = arith.constant 0.176776692 : f32
    %200 = vector.broadcast %cst_98 : f32 to vector<8x8xf32>
    %201 = arith.mulf %199, %200 : vector<8x8xf32>
    %202 = vector.broadcast %24 : vector<1x8xf32> to vector<8x8xf32>
    %203 = arith.addf %201, %202 : vector<8x8xf32>
    %cst_99 = arith.constant dense<0xFF800000> : vector<8xf32>
    %204 = vector.multi_reduction <maximumf>, %203, %cst_99 [1] : vector<8x8xf32> to vector<8xf32>
    %205 = vector.shape_cast %204 : vector<8xf32> to vector<8x1xf32>
    %206 = vector.broadcast %205 : vector<8x1xf32> to vector<8x8xf32>
    %207 = arith.subf %203, %206 : vector<8x8xf32>
    %208 = math.exp %207 : vector<8x8xf32>
    %cst_100 = arith.constant dense<0.000000e+00> : vector<8xf32>
    %209 = vector.multi_reduction <add>, %208, %cst_100 [1] : vector<8x8xf32> to vector<8xf32>
    %210 = vector.shape_cast %209 : vector<8xf32> to vector<8x1xf32>
    %211 = tpu.reciprocal %210 {approx = true} : vector<8x1xf32> -> vector<8x1xf32>
    %212 = vector.broadcast %211 : vector<8x1xf32> to vector<8x8xf32>
    %213 = arith.mulf %208, %212 : vector<8x8xf32>
    %cst_101 = arith.constant dense<0.000000e+00> : vector<8x32xf32>
    %214 = tpu.matmul %213, %198, %cst_101 {dimension_numbers = #tpu.dot_dimension_numbers<[1], [0], [0], [1], [0, 0, 1, 1], [], []>} : vector<8x8xf32>, vector<8x32xf32>, vector<8x32xf32> -> vector<8x32xf32>
    %215 = vector.extract_strided_slice %168 {offsets = [32, 0], sizes = [32, 64], strides = [1, 1]} : vector<64x64xf32> to vector<32x64xf32>
    %cst_102 = arith.constant dense<0.000000e+00> : vector<8x64xf32>
    %216 = tpu.matmul %214, %215, %cst_102 {dimension_numbers = #tpu.dot_dimension_numbers<[1], [0], [0], [1], [0, 0, 1, 1], [], []>} : vector<8x32xf32>, vector<32x64xf32>, vector<8x64xf32> -> vector<8x64xf32>
    %217 = arith.addf %195, %216 : vector<8x64xf32>
    %218 = arith.addf %217, %159 : vector<8x64xf32>
    %c1_103 = arith.constant 1 : index
    %c0_104 = arith.constant 0 : index
    %c0_105 = arith.constant 0 : index
    %219 = vector.load %arg9[%c1_103, %c0_104, %c0_105] : memref<2x1x64xf32, #tpu.memory_space<vmem>>, vector<1x1x64xf32>
    %220 = vector.shape_cast %219 : vector<1x1x64xf32> to vector<1x64xf32>
    %c1_106 = arith.constant 1 : index
    %c0_107 = arith.constant 0 : index
    %c0_108 = arith.constant 0 : index
    %221 = vector.load %arg10[%c1_106, %c0_107, %c0_108] : memref<2x1x64xf32, #tpu.memory_space<vmem>>, vector<1x1x64xf32>
    %222 = vector.shape_cast %221 : vector<1x1x64xf32> to vector<1x64xf32>
    %cst_109 = arith.constant dense<0.000000e+00> : vector<8xf32>
    %223 = vector.multi_reduction <add>, %218, %cst_109 [1] : vector<8x64xf32> to vector<8xf32>
    %224 = vector.shape_cast %223 : vector<8xf32> to vector<8x1xf32>
    %cst_110 = arith.constant 6.400000e+01 : f32
    %225 = vector.broadcast %cst_110 : f32 to vector<8x1xf32>
    %226 = arith.divf %224, %225 : vector<8x1xf32>
    %227 = vector.broadcast %226 : vector<8x1xf32> to vector<8x64xf32>
    %228 = arith.subf %218, %227 : vector<8x64xf32>
    %229 = arith.mulf %228, %228 : vector<8x64xf32>
    %cst_111 = arith.constant dense<0.000000e+00> : vector<8xf32>
    %230 = vector.multi_reduction <add>, %229, %cst_111 [1] : vector<8x64xf32> to vector<8xf32>
    %231 = vector.shape_cast %230 : vector<8xf32> to vector<8x1xf32>
    %cst_112 = arith.constant 6.400000e+01 : f32
    %232 = vector.broadcast %cst_112 : f32 to vector<8x1xf32>
    %233 = arith.divf %231, %232 : vector<8x1xf32>
    %cst_113 = arith.constant 9.99999996E-13 : f32
    %234 = vector.broadcast %cst_113 : f32 to vector<8x1xf32>
    %235 = arith.addf %233, %234 : vector<8x1xf32>
    %236 = math.rsqrt %235 : vector<8x1xf32>
    %237 = vector.broadcast %236 : vector<8x1xf32> to vector<8x64xf32>
    %238 = arith.mulf %228, %237 : vector<8x64xf32>
    %239 = vector.broadcast %220 : vector<1x64xf32> to vector<8x64xf32>
    %240 = arith.mulf %238, %239 : vector<8x64xf32>
    %241 = vector.broadcast %222 : vector<1x64xf32> to vector<8x64xf32>
    %242 = arith.addf %240, %241 : vector<8x64xf32>
    %c1_114 = arith.constant 1 : index
    %c0_115 = arith.constant 0 : index
    %c0_116 = arith.constant 0 : index
    %243 = vector.load %arg11[%c1_114, %c0_115, %c0_116] : memref<2x64x128xf32, #tpu.memory_space<vmem>>, vector<1x64x128xf32>
    %244 = vector.shape_cast %243 : vector<1x64x128xf32> to vector<64x128xf32>
    %cst_117 = arith.constant dense<0.000000e+00> : vector<8x128xf32>
    %245 = tpu.matmul %242, %244, %cst_117 {dimension_numbers = #tpu.dot_dimension_numbers<[1], [0], [0], [1], [0, 0, 1, 1], [], []>} : vector<8x64xf32>, vector<64x128xf32>, vector<8x128xf32> -> vector<8x128xf32>
    %c1_118 = arith.constant 1 : index
    %c0_119 = arith.constant 0 : index
    %c0_120 = arith.constant 0 : index
    %246 = vector.load %arg12[%c1_118, %c0_119, %c0_120] : memref<2x1x128xf32, #tpu.memory_space<vmem>>, vector<1x1x128xf32>
    %247 = vector.shape_cast %246 : vector<1x1x128xf32> to vector<1x128xf32>
    %248 = vector.broadcast %247 : vector<1x128xf32> to vector<8x128xf32>
    %249 = arith.addf %245, %248 : vector<8x128xf32>
    %250 = arith.mulf %249, %249 : vector<8x128xf32>
    %251 = arith.mulf %249, %250 : vector<8x128xf32>
    %cst_121 = arith.constant 4.471500e-02 : f32
    %252 = vector.broadcast %cst_121 : f32 to vector<8x128xf32>
    %253 = arith.mulf %252, %251 : vector<8x128xf32>
    %254 = arith.addf %249, %253 : vector<8x128xf32>
    %cst_122 = arith.constant 0.797884583 : f32
    %255 = vector.broadcast %cst_122 : f32 to vector<8x128xf32>
    %256 = arith.mulf %255, %254 : vector<8x128xf32>
    %257 = math.tanh %256 : vector<8x128xf32>
    %cst_123 = arith.constant 1.000000e+00 : f32
    %258 = vector.broadcast %cst_123 : f32 to vector<8x128xf32>
    %259 = arith.addf %258, %257 : vector<8x128xf32>
    %cst_124 = arith.constant 5.000000e-01 : f32
    %260 = vector.broadcast %cst_124 : f32 to vector<8x128xf32>
    %261 = arith.mulf %260, %259 : vector<8x128xf32>
    %262 = arith.mulf %249, %261 : vector<8x128xf32>
    %c1_125 = arith.constant 1 : index
    %c0_126 = arith.constant 0 : index
    %c0_127 = arith.constant 0 : index
    %263 = vector.load %arg13[%c1_125, %c0_126, %c0_127] : memref<2x128x64xf32, #tpu.memory_space<vmem>>, vector<1x128x64xf32>
    %264 = vector.shape_cast %263 : vector<1x128x64xf32> to vector<128x64xf32>
    %cst_128 = arith.constant dense<0.000000e+00> : vector<8x64xf32>
    %265 = tpu.matmul %262, %264, %cst_128 {dimension_numbers = #tpu.dot_dimension_numbers<[1], [0], [0], [1], [0, 0, 1, 1], [], []>} : vector<8x128xf32>, vector<128x64xf32>, vector<8x64xf32> -> vector<8x64xf32>
    %c1_129 = arith.constant 1 : index
    %c0_130 = arith.constant 0 : index
    %c0_131 = arith.constant 0 : index
    %266 = vector.load %arg14[%c1_129, %c0_130, %c0_131] : memref<2x1x64xf32, #tpu.memory_space<vmem>>, vector<1x1x64xf32>
    %267 = vector.shape_cast %266 : vector<1x1x64xf32> to vector<1x64xf32>
    %268 = vector.broadcast %267 : vector<1x64xf32> to vector<8x64xf32>
    %269 = arith.addf %265, %268 : vector<8x64xf32>
    %270 = arith.addf %269, %242 : vector<8x64xf32>
    %c1_132 = arith.constant 1 : index
    %c0_133 = arith.constant 0 : index
    %c0_134 = arith.constant 0 : index
    %271 = vector.load %arg15[%c1_132, %c0_133, %c0_134] : memref<2x1x64xf32, #tpu.memory_space<vmem>>, vector<1x1x64xf32>
    %272 = vector.shape_cast %271 : vector<1x1x64xf32> to vector<1x64xf32>
    %c1_135 = arith.constant 1 : index
    %c0_136 = arith.constant 0 : index
    %c0_137 = arith.constant 0 : index
    %273 = vector.load %arg16[%c1_135, %c0_136, %c0_137] : memref<2x1x64xf32, #tpu.memory_space<vmem>>, vector<1x1x64xf32>
    %274 = vector.shape_cast %273 : vector<1x1x64xf32> to vector<1x64xf32>
    %cst_138 = arith.constant dense<0.000000e+00> : vector<8xf32>
    %275 = vector.multi_reduction <add>, %270, %cst_138 [1] : vector<8x64xf32> to vector<8xf32>
    %276 = vector.shape_cast %275 : vector<8xf32> to vector<8x1xf32>
    %cst_139 = arith.constant 6.400000e+01 : f32
    %277 = vector.broadcast %cst_139 : f32 to vector<8x1xf32>
    %278 = arith.divf %276, %277 : vector<8x1xf32>
    %279 = vector.broadcast %278 : vector<8x1xf32> to vector<8x64xf32>
    %280 = arith.subf %270, %279 : vector<8x64xf32>
    %281 = arith.mulf %280, %280 : vector<8x64xf32>
    %cst_140 = arith.constant dense<0.000000e+00> : vector<8xf32>
    %282 = vector.multi_reduction <add>, %281, %cst_140 [1] : vector<8x64xf32> to vector<8xf32>
    %283 = vector.shape_cast %282 : vector<8xf32> to vector<8x1xf32>
    %cst_141 = arith.constant 6.400000e+01 : f32
    %284 = vector.broadcast %cst_141 : f32 to vector<8x1xf32>
    %285 = arith.divf %283, %284 : vector<8x1xf32>
    %cst_142 = arith.constant 9.99999996E-13 : f32
    %286 = vector.broadcast %cst_142 : f32 to vector<8x1xf32>
    %287 = arith.addf %285, %286 : vector<8x1xf32>
    %288 = math.rsqrt %287 : vector<8x1xf32>
    %289 = vector.broadcast %288 : vector<8x1xf32> to vector<8x64xf32>
    %290 = arith.mulf %280, %289 : vector<8x64xf32>
    %291 = vector.broadcast %272 : vector<1x64xf32> to vector<8x64xf32>
    %292 = arith.mulf %290, %291 : vector<8x64xf32>
    %293 = vector.broadcast %274 : vector<1x64xf32> to vector<8x64xf32>
    %294 = arith.addf %292, %293 : vector<8x64xf32>
    %295 = vector.extract_strided_slice %294 {offsets = [0, 0], sizes = [1, 64], strides = [1, 1]} : vector<8x64xf32> to vector<1x64xf32>
    %c0_143 = arith.constant 0 : index
    %c0_144 = arith.constant 0 : index
    %296 = vector.load %arg17[%c0_143, %c0_144] : memref<64x64xf32, #tpu.memory_space<vmem>>, vector<64x64xf32>
    %cst_145 = arith.constant dense<0.000000e+00> : vector<1x64xf32>
    %297 = tpu.matmul %295, %296, %cst_145 {dimension_numbers = #tpu.dot_dimension_numbers<[1], [0], [0], [1], [0, 0, 1, 1], [], []>} : vector<1x64xf32>, vector<64x64xf32>, vector<1x64xf32> -> vector<1x64xf32>
    %c0_146 = arith.constant 0 : index
    %c0_147 = arith.constant 0 : index
    %298 = vector.load %arg18[%c0_146, %c0_147] : memref<1x64xf32, #tpu.memory_space<vmem>>, vector<1x64xf32>
    %299 = arith.addf %297, %298 : vector<1x64xf32>
    %300 = math.tanh %299 : vector<1x64xf32>
    %c0_148 = arith.constant 0 : index
    %c0_149 = arith.constant 0 : index
    %301 = vector.load %arg19[%c0_148, %c0_149] : memref<64x128xf32, #tpu.memory_space<vmem>>, vector<64x128xf32>
    %cst_150 = arith.constant dense<0.000000e+00> : vector<1x128xf32>
    %302 = tpu.matmul %300, %301, %cst_150 {dimension_numbers = #tpu.dot_dimension_numbers<[1], [0], [0], [1], [0, 0, 1, 1], [], []>} : vector<1x64xf32>, vector<64x128xf32>, vector<1x128xf32> -> vector<1x128xf32>
    %c0_151 = arith.constant 0 : index
    %c0_152 = arith.constant 0 : index
    %303 = vector.load %arg20[%c0_151, %c0_152] : memref<1x128xf32, #tpu.memory_space<vmem>>, vector<1x128xf32>
    %304 = arith.addf %302, %303 : vector<1x128xf32>
    %c0_153 = arith.constant 0 : index
    %c0_154 = arith.constant 0 : index
    %c0_155 = arith.constant 0 : index
    %305 = vector.load %arg21[%c0_153, %c0_154, %c0_155] : memref<1x1x128xf32, #tpu.memory_space<vmem>>, vector<1x1x128xf32>
    %306 = vector.shape_cast %305 : vector<1x1x128xf32> to vector<1x128xf32>
    %307 = vector.shape_cast %304 : vector<1x128xf32> to vector<1x1x128xf32>
    tpu.vector_store %arg21[%c0_153, %c0_154, %c0_155], %307 {strides = array<i32>} : memref<1x1x128xf32, #tpu.memory_space<vmem>>, vector<1x1x128xf32>,
    return
  }
  func.func @transform_0(%arg0: i32) -> (i32, i32) {
    %c0_i32 = arith.constant 0 : i32
    %c0_i32_0 = arith.constant 0 : i32
    return %arg0, %c0_i32 : i32, i32
  }
  func.func @transform_1(%arg0: i32) -> (i32, i32, i32) {
    %c0_i32 = arith.constant 0 : i32
    %c0_i32_0 = arith.constant 0 : i32
    %c0_i32_1 = arith.constant 0 : i32
    return %arg0, %c0_i32, %c0_i32_0 : i32, i32, i32
  }
  func.func @transform_2(%arg0: i32) -> (i32, i32) {
    %c0_i32 = arith.constant 0 : i32
    %c0_i32_0 = arith.constant 0 : i32
    %c0_i32_1 = arith.constant 0 : i32
    return %c0_i32, %c0_i32_0 : i32, i32
  }
  func.func @transform_3(%arg0: i32) -> (i32, i32) {
    %c0_i32 = arith.constant 0 : i32
    %c0_i32_0 = arith.constant 0 : i32
    %c0_i32_1 = arith.constant 0 : i32
    return %c0_i32, %c0_i32_0 : i32, i32
  }
  func.func @transform_4(%arg0: i32) -> (i32, i32, i32) {
    %c0_i32 = arith.constant 0 : i32
    %c0_i32_0 = arith.constant 0 : i32
    %c0_i32_1 = arith.constant 0 : i32
    %c0_i32_2 = arith.constant 0 : i32
    return %c0_i32, %c0_i32_0, %c0_i32_1 : i32, i32, i32
  }
  func.func @transform_5(%arg0: i32) -> (i32, i32, i32) {
    %c0_i32 = arith.constant 0 : i32
    %c0_i32_0 = arith.constant 0 : i32
    %c0_i32_1 = arith.constant 0 : i32
    %c0_i32_2 = arith.constant 0 : i32
    return %c0_i32, %c0_i32_0, %c0_i32_1 : i32, i32, i32
  }
  func.func @transform_6(%arg0: i32) -> (i32, i32, i32) {
    %c0_i32 = arith.constant 0 : i32
    %c0_i32_0 = arith.constant 0 : i32
    %c0_i32_1 = arith.constant 0 : i32
    %c0_i32_2 = arith.constant 0 : i32
    return %c0_i32, %c0_i32_0, %c0_i32_1 : i32, i32, i32
  }
  func.func @transform_7(%arg0: i32) -> (i32, i32, i32) {
    %c0_i32 = arith.constant 0 : i32
    %c0_i32_0 = arith.constant 0 : i32
    %c0_i32_1 = arith.constant 0 : i32
    %c0_i32_2 = arith.constant 0 : i32
    return %c0_i32, %c0_i32_0, %c0_i32_1 : i32, i32, i32
  }
  func.func @transform_8(%arg0: i32) -> (i32, i32, i32) {
    %c0_i32 = arith.constant 0 : i32
    %c0_i32_0 = arith.constant 0 : i32
    %c0_i32_1 = arith.constant 0 : i32
    %c0_i32_2 = arith.constant 0 : i32
    return %c0_i32, %c0_i32_0, %c0_i32_1 : i32, i32, i32
  }
  func.func @transform_9(%arg0: i32) -> (i32, i32, i32) {
    %c0_i32 = arith.constant 0 : i32
    %c0_i32_0 = arith.constant 0 : i32
    %c0_i32_1 = arith.constant 0 : i32
    %c0_i32_2 = arith.constant 0 : i32
    return %c0_i32, %c0_i32_0, %c0_i32_1 : i32, i32, i32
  }
  func.func @transform_10(%arg0: i32) -> (i32, i32, i32) {
    %c0_i32 = arith.constant 0 : i32
    %c0_i32_0 = arith.constant 0 : i32
    %c0_i32_1 = arith.constant 0 : i32
    %c0_i32_2 = arith.constant 0 : i32
    return %c0_i32, %c0_i32_0, %c0_i32_1 : i32, i32, i32
  }
  func.func @transform_11(%arg0: i32) -> (i32, i32, i32) {
    %c0_i32 = arith.constant 0 : i32
    %c0_i32_0 = arith.constant 0 : i32
    %c0_i32_1 = arith.constant 0 : i32
    %c0_i32_2 = arith.constant 0 : i32
    return %c0_i32, %c0_i32_0, %c0_i32_1 : i32, i32, i32
  }
  func.func @transform_12(%arg0: i32) -> (i32, i32, i32) {
    %c0_i32 = arith.constant 0 : i32
    %c0_i32_0 = arith.constant 0 : i32
    %c0_i32_1 = arith.constant 0 : i32
    %c0_i32_2 = arith.constant 0 : i32
    return %c0_i32, %c0_i32_0, %c0_i32_1 : i32, i32, i32
  }
  func.func @transform_13(%arg0: i32) -> (i32, i32, i32) {
    %c0_i32 = arith.constant 0 : i32
    %c0_i32_0 = arith.constant 0 : i32
    %c0_i32_1 = arith.constant 0 : i32
    %c0_i32_2 = arith.constant 0 : i32
    return %c0_i32, %c0_i32_0, %c0_i32_1 : i32, i32, i32
  }
  func.func @transform_14(%arg0: i32) -> (i32, i32, i32) {
    %c0_i32 = arith.constant 0 : i32
    %c0_i32_0 = arith.constant 0 : i32
    %c0_i32_1 = arith.constant 0 : i32
    %c0_i32_2 = arith.constant 0 : i32
    return %c0_i32, %c0_i32_0, %c0_i32_1 : i32, i32, i32
  }
  func.func @transform_15(%arg0: i32) -> (i32, i32, i32) {
    %c0_i32 = arith.constant 0 : i32
    %c0_i32_0 = arith.constant 0 : i32
    %c0_i32_1 = arith.constant 0 : i32
    %c0_i32_2 = arith.constant 0 : i32
    return %c0_i32, %c0_i32_0, %c0_i32_1 : i32, i32, i32
  }
  func.func @transform_16(%arg0: i32) -> (i32, i32) {
    %c0_i32 = arith.constant 0 : i32
    %c0_i32_0 = arith.constant 0 : i32
    %c0_i32_1 = arith.constant 0 : i32
    return %c0_i32, %c0_i32_0 : i32, i32
  }
  func.func @transform_17(%arg0: i32) -> (i32, i32) {
    %c0_i32 = arith.constant 0 : i32
    %c0_i32_0 = arith.constant 0 : i32
    %c0_i32_1 = arith.constant 0 : i32
    return %c0_i32, %c0_i32_0 : i32, i32
  }
  func.func @transform_18(%arg0: i32) -> (i32, i32) {
    %c0_i32 = arith.constant 0 : i32
    %c0_i32_0 = arith.constant 0 : i32
    %c0_i32_1 = arith.constant 0 : i32
    return %c0_i32, %c0_i32_0 : i32, i32
  }
  func.func @transform_19(%arg0: i32) -> (i32, i32) {
    %c0_i32 = arith.constant 0 : i32
    %c0_i32_0 = arith.constant 0 : i32
    %c0_i32_1 = arith.constant 0 : i32
    return %c0_i32, %c0_i32_0 : i32, i32
  }
  func.func @transform_20(%arg0: i32) -> (i32, i32, i32) {
    %c0_i32 = arith.constant 0 : i32
    %c0_i32_0 = arith.constant 0 : i32
    %c0_i32_1 = arith.constant 0 : i32
    return %arg0, %c0_i32, %c0_i32_0 : i32, i32, i32
  }
}

</mosaic_0001>

<bundles_post_ra>
// kernel: forward.1
= control target key start
LH: loop header
LB: loop body
LE: loop exit
PB: predicated region body
PF: predicated region fallthrough
CT: control target
= control target key end

     0   :  { %s4020_s0 = inlined_call_operand.vmem [shape: f32[16,64], index: 0, kind: input, shape index: {}]   ;;  %s4021_s1 = inlined_call_operand.vmem [shape: f32[2,1,8], index: 1, kind: input, shape index: {}]   ;;  %s4022_s2 = inlined_call_operand.vmem [shape: f32[1,64], index: 2, kind: input, shape index: {}]   ;;  %s4023_s3 = inlined_call_operand.vmem [shape: f32[1,64], index: 3, kind: input, shape index: {}]   ;;  %s4024_s4 = inlined_call_operand.vmem [shape: f32[2,64,192], index: 4, kind: input, shape index: {}]   ;;  %s4025_s5 = inlined_call_operand.vmem [shape: f32[2,1,192], index: 5, kind: input, shape index: {}]   ;;  %s4026_s6 = inlined_call_operand.vmem [shape: f32[2,64,64], index: 6, kind: input, shape index: {}]   ;;  %s4027_s7 = inlined_call_operand.vmem [shape: f32[2,1,64], index: 7, kind: input, shape index: {}]   ;;  %s4028_s8 = inlined_call_operand.vmem [shape: f32[2,1,64], index: 8, kind: input, shape index: {}]   ;;  %s4029_s9 = inlined_call_operand.vmem [shape: f32[2,1,64], index: 9, kind: input, shape index: {}]   ;;  %s4030_s10 = inlined_call_operand.vmem [shape: f32[2,64,128], index: 10, kind: input, shape index: {}]   ;;  %s4031_s11 = inlined_call_operand.vmem [shape: f32[2,1,128], index: 11, kind: input, shape index: {}]   ;;  %s4032_s12 = inlined_call_operand.vmem [shape: f32[2,128,64], index: 12, kind: input, shape index: {}]   ;;  %s4033_s13 = inlined_call_operand.vmem [shape: f32[2,1,64], index: 13, kind: input, shape index: {}]   ;;  %s4034_s14 = inlined_call_operand.vmem [shape: f32[2,1,64], index: 14, kind: input, shape index: {}]   ;;  %s4035_s15 = inlined_call_operand.vmem [shape: f32[2,1,64], index: 15, kind: input, shape index: {}]   ;;  %s4036_s16 = inlined_call_operand.vmem [shape: f32[64,64], index: 16, kind: input, shape index: {}]   ;;  %s4037_s17 = inlined_call_operand.vmem [shape: f32[1,64], index: 17, kind: input, shape index: {}]   ;;  %s4038_s18 = inlined_call_operand.vmem [shape: f32[64,128], index: 18, kind: input, shape index: {}]   ;;  %s4039_s19 = inlined_call_operand.vmem [shape: f32[1,128], index: 19, kind: input, shape index: {}]   ;;  %s4040_s20 = inlined_call_operand.hbm [shape: f32[2,1,128], index: 20, kind: output, shape index: {}]  }
   0x1   :  { %4052 = sst [smem:[#allocation11_spill]] %s4020_s0 }
   0x2   :  { %4053 = sst [smem:[#allocation12_spill]] %s4021_s1 }
   0x3   :  { %4054 = sst [smem:[#allocation13_spill]] %s4022_s2 }
   0x4   :  { %4055 = sst [smem:[#allocation14_spill]] %s4023_s3 }
   0x5   :  { %4056 = sst [smem:[#allocation15_spill]] %s4024_s4 }
   0x6   :  { %25 = vsyncpa [#allocation3], 0 }
   0x7   :  { %27 = vsyncpa [#allocation3 + $0x1], 0  ;;  %s3316_s1 = smov 0   ;;  %s3318_s22 = smov 0  }
   0x8   :  { %s3320_s23 = smov 0   ;;  %s3322_s24 = smov 0  }
   0x9 LB: > { %4057 = sst [smem:[#allocation5_spill]] %s3191_s1  ;;  %s3337_s2 = sadd.s32 4294967295, %s3203_s24   ;;  %s3203_s24 = sphi %s3322_s24, %s4075_s24   ;;  %s3199_s23 = sphi %s3320_s23, %s4077_s23   ;;  %s3195_s22 = sphi %s3318_s22, %s4079_s22   ;;  %s3191_s1 = sphi %s3316_s1, %s4078_s1  }
   0xa   : > { %4058 = sst [smem:[#allocation6_spill]] %s3199_s23  ;;  %s2628_s25 = sadd.s32 4294967294, %s3203_s24  }
   0xb   : > { %4059 = sst [smem:[#allocation7_spill]] %s3203_s24  ;;  %s3341_s3 = sadd.s32 1, %s3203_s24  }
   0xc   : > { %4060 = sst [smem:[#allocation8_spill]] %s3341_s3  ;;  %s470_s26 = sadd.s32 1, %s3199_s23 }
   0xd   : > { %s467_s27 = ssub.s32 %s3203_s24, %s3341_s3  ;;  %p480_p0 = scmp.ne.s32.totalorder %s3199_s23, %s3195_s22 }
   0xe   : > { %p468_p1 = scmp.eq.s32.totalorder %s467_s27, 0  ;;  %p481_p2 = scmp.eq.s32.totalorder %s3337_s2, 1 }
   0xf   : > { %p486_p3 = scmp.ne.s32.totalorder %s3195_s22, %s3191_s1  ;;  %p487_p4 = scmp.eq.s32.totalorder %s2628_s25, 1 }
  0x10   : > { %s3352_s28 = scalar_select %p468_p1, %s3199_s23, %s470_s26  }
  0x11   : > { %p3354_p5 = por %p481_p2, %p480_p0  ;;  %p3358_p6 = por %p487_p4, %p486_p3 }
  0x12   : > { %4061 = sst [smem:[#allocation9_spill]] %s3352_s28  ;;  %p2631_p7 = scmp.ge.s32.totalorder %s3203_s24, 1 }
  0x13   : > { %s4063_s29 = scalar_select %p3358_p6, 1, 0 }
  0x14   : > { %p572_p8 = scmp.lt.s32.totalorder %s3203_s24, 3 }
  0x15   : > { %4064 = sst [smem:[#allocation10_spill]] %s4063_s29 }
  0x16   : > { %p573_p9 = pnand %p2631_p7, %p572_p8 }
  0x17   : > { %p631_p10 = scmp.lt.s32.totalorder (!%p573_p9), %s3337_s2, 1  ;;  %s4065_s26 = sld [smem:[#allocation11_spill]] (!%p573_p9) }
  0x18   : > { %576 = sbr.rel (%p573_p9) target bundleno = 5969 (0x1751), region = 100  ;;  %s4066_s3 = sld [smem:[#allocation15_spill]] (!%p573_p9) }
  0x19   : > { %s4067_s21 = sld [smem:[#allocation13_spill]] (!%p573_p9)  ;;  %s4049_s1 = smov (!%p573_p9), 96  }
  0x1a   : > { %s3208_s28 = smov (!%p573_p9), 64   ;;  %s4048_s29 = smov (!%p573_p9), 32  }
  0x1b   : > { %s4069_s25 = sld [smem:[#allocation12_spill]] (!%p573_p9)  ;;  %s629_s23 = sand.u32 (!%p573_p9), 1, %s3195_s22  }
  0x1c   : > { %s2552_s24 = scalar_lea.sflag (!%p573_p9), [#allocation3], %s629_s23 }
  0x1d   : > { %s3366_s30 = scalar_select %p631_p10, %s3337_s2, 1  ;;  %vm641_vm0 = vcmask 523264   ;;  %v3205_v11 = vmov 0.0   ;;  %v689_v33 = vlaneseq  ;;  %vm3206_vm1 = vmmov 0   ;;  %v687_v36 = vld [vmem:[%s4025_s5] sm:$0x3] }
  0x1e   : > { %v686_v7 = vld [vmem:[%s4066_s3 + $0x78] sm:$0xff]  ;;  %v685_v8 = vld [vmem:[%s4066_s3 + $0x70] sm:$0xff]  ;;  %v684_v9 = vld [vmem:[%s4066_s3 + $0x68] sm:$0xff]  ;;  %766 = vmatprep.mubr.f32.mxu0 %v3205_v11  ;;  %2842 = vmatprep.subr.mxu1 %v3205_v11  ;;  %vm792_vm2 = vcmask 261120   ;;  %vm875_vm3 = vcmask 64512  }
  0x1f   : > { %s2632_s0 = sshll.u32 %s3366_s30, 3  ;;  %718 = vmatprep.subr.mxu0 %v686_v7  ;;  %v683_v10 = vld [vmem:[%s4066_s3 + $0x60] sm:$0xff]  ;;  %v682_v12 = vld [vmem:[%s4066_s3 + $0x58] sm:$0xff]  ;;  %v681_v13 = vld [vmem:[%s4066_s3 + $0x50] sm:$0xff]  ;;  %v3435_v34 = vshrl.u32 %v689_v33, 7  ;;  %2844 = vmatprep.mubr.msk.f32.mxu1 %vm3206_vm1, %v3205_v11 }
  0x20   : > { %s634_s27 = scalar_lea.vmem %s4065_s26, %s2632_s0  ;;  %719 = vmatpush1.msra.mxu0 %v685_v8  ;;  %v680_v14 = vld [vmem:[%s4066_s3 + $0x48] sm:$0xff]  ;;  %v679_v15 = vld [vmem:[%s4066_s3 + $0x40] sm:$0xff]  ;;  %v678_v16 = vld [vmem:[%s4066_s3 + $0x38] sm:$0xff]  ;;  %s3210_s0 = smov [#allocation2]  }
  0x21   : > { %v638_v0 = vld [vmem:[%s634_s27] sm:$0xff]  ;;  %720 = vmatprep.subr.mxu0 %v684_v9  ;;  %v677_v17 = vld [vmem:[%s4066_s3 + $0x30] sm:$0xff]  ;;  %v676_v18 = vld [vmem:[%s4066_s3 + $0x28] sm:$0xff]  ;;  %s4068_s27 = sld [smem:[#allocation14_spill]]  ;;  %v691_v35 = vsub.s32 0, %v3435_v34  ;;  %v695_v37 = vsub.s32 1, %v3435_v34  ;;  %s637_s26 = scalar_lea.vmem %s4069_s25, %s3366_s30 }
  0x22   : > { %v642_v1 = vsel %vm641_vm0, %v638_v0, 0.0  ;;  %721 = vmatpush1.msra.mxu0 %v683_v10  ;;  %v675_v19 = vld [vmem:[%s4066_s3 + $0x20] sm:$0xff]  ;;  %v674_v20 = vld [vmem:[%s4066_s3 + $0x18] sm:$0xff]  ;;  %v673_v21 = vld [vmem:[%s4066_s3 + $0x10] sm:$0xff]  ;;  %s2728_s25 = sshll.u32 %s3337_s2, 4  ;;  %s3147_s2 = sshll.u32 %s3210_s0, 4  ;;  %s3148_s2 = int_to_ptr.vmem [resolvable:$false] %s3147_s2 }
  0x23   : > { %643 = vadd.xlane.f32.xlu0 %v642_v1  ;;  %722 = vmatprep.subr.mxu0 %v682_v12  ;;  %v672_v22 = vld [vmem:[%s4066_s3 + $0x8] sm:$0xff]  ;;  %v671_v23 = vld [vmem:[%s4066_s3] sm:$0xff]  ;;  %v692_v38 = vrot.slane %v687_v36, %v691_v35  ;;  %v696_v39 = vrot.slane %v687_v36, %v695_v37  ;;  %v776_v7 = vld [vmem:[%s4026_s6 + $0x18] sm:$0xff] }
  0x24   : > { %723 = vmatpush1.msra.mxu0 %v681_v13  ;;  %v2633_v28 = vld [vmem:[%s4067_s21] ss:$0 sm:$0xff]  ;;  %v775_v8 = vld [vmem:[%s4026_s6 + $0x10] sm:$0xff]  ;;  %v774_v9 = vld [vmem:[%s4026_s6 + $0x8] sm:$0xff]  ;;  %s3149_s21 = scalar_lea.vmem %s3148_s2, 32 }
  0x25   : > { %724 = vmatprep.subr.mxu0 %v680_v14  ;;  %v3468_v47 = vld [vmem:[%s637_s26] ss:$0 sm:$0xff]  ;;  %v780_v12 = vld [vmem:[%s4026_s6 + $0x38] sm:$0xff]  ;;  %s630_s26 = scalar_lea.vmem [#allocation2], %s629_s23 }
  0x26   : > { %725 = vmatpush1.msra.mxu0 %v679_v15  ;;  %v773_v10 = vld [vmem:[%s4026_s6] sm:$0xff]  ;;  %s2564_s30 = sshll.u32 %s630_s26, 4  ;;  %s2565_s30 = int_to_ptr.vmem [resolvable:$true] %s2564_s30 }
  0x27   : > { %726 = vmatprep.subr.mxu0 %v678_v16  ;;  %v2634_v30 = vld [vmem:[%s4068_s27] ss:$0 sm:$0xff]  ;;  %p3150_p0 = scmp.lt.s32.totalorder %s2565_s30, %s3148_s2 }
  0x28   : > { %727 = vmatpush1.msra.mxu0 %v677_v17 }
  0x29   : > { %728 = vmatprep.subr.mxu0 %v676_v18 }
  0x2a   : > { %729 = vmatpush1.msra.mxu0 %v675_v19  ;;  %v779_v19 = vld [vmem:[%s4026_s6 + $0x30] sm:$0xff] }
  0x2b   : > { %730 = vmatprep.subr.mxu0 %v674_v20  ;;  %v778_v20 = vld [vmem:[%s4026_s6 + $0x28] sm:$0xff] }
  0x2c   : > { %731 = vmatpush1.msra.mxu0 %v673_v21  ;;  %v777_v21 = vld [vmem:[%s4026_s6 + $0x20] sm:$0xff] }
  0x2d   : > { %732 = vmatprep.subr.mxu0 %v672_v22 }
  0x2e   : > { %733 = vmatpush1.msra.mxu0 %v671_v23 }
  0x2f   : > { %2837 = vmatprep.subr.mxu0 %v3205_v11 }
  0xac   : > { %v644_v2 = vpop.xlane.xlu0 %643 }
  0xad   : > { %v646_v3 = vmul.f32 0.015625, %v644_v2 }
  0xaf   : > { %v647_v4 = vsub.f32 %v638_v0, %v646_v3 }
  0xb1   : > { %v648_v5 = vmul.f32 %v647_v4, %v647_v4 }
  0xb3   : > { %v649_v6 = vsel %vm641_vm0, %v648_v5, 0.0 }
  0xb4   : > { %650 = vadd.xlane.f32.xlu0 %v649_v6 }
 0x13d   : > { %v651_v24 = vpop.xlane.xlu0 %650 }
 0x13e   : > { %v652_v25 = vmul.f32 0.015625, %v651_v24 }
 0x140   : > { %v653_v26 = vadd.f32 1e-12, %v652_v25 }
 0x142   : > { %3111 = vrsqrt.f32 %v653_v26  ;;  %v2636_v26 = vld [vmem:[%s4027_s7] ss:$0 sm:$0xff] }
 0x14f   : > { %v3112_v27 = vpop.eup %3111 }
 0x150   : > { %v655_v29 = vmul.f32 %v3112_v27, %v647_v4 }
 0x152   : > { %v662_v31 = vmul.f32 %v2633_v28, %v655_v29 }
 0x154   : > { %v3431_v32 = vadd.f32 %v2634_v30, %v662_v31 }
 0x156   : > { %2635 = vmatmul.mubr.msk.f32.vlgmr.msra.gmra.mxu0 %vm641_vm0, %v3431_v32 }
 0x157   : > { %2839 = vmatprep.mubr.msk.f32.mxu0 %vm3206_vm1, %v3205_v11 }
 0x216   : > { %v768_v40 = vpop.f32.mrf.mxu0 }
 0x217   : > { %v769_v41 = vadd.f32 %v768_v40, %v692_v38 }
 0x218   : > { %v770_v42 = vpop.f32.mrf.mxu0 }
 0x219   : > { %v771_v43 = vadd.f32 %v770_v42, %v696_v39  ;;  %1034 = vrot.lane.b32.xlu0 %v769_v41, %s4049_s1  ;;  %790 = vrot.lane.b32.xlu1 %v769_v41, %s3208_s28  ;;  %v1313_v42 = vld [vmem:[%s4030_s10 + $0x38] sm:$0xff] }
 0x21b   : > { %2843 = vmatpush3.msra.mxu1 %v771_v43 }
 0x21c   : > { %2847 = vmatprep.subr.mxu1 %v3205_v11 }
 0x21d   : > { %1036 = vrot.lane.b32.xlu1 %v769_v41, %s4048_s29  ;;  %s3985_s29 = scalar_lea.hbm %s4040_s20, %s2728_s25 }
 0x28b   : > { %v791_v44 = vpop.permute.xlu1 %790  ;;  %v1035_v46 = vpop.permute.xlu0 %1034 }
 0x28c   : > { %2838 = vmatpush3.xpose.msk.msra.mxu0 %vm792_vm2, %v791_v44  ;;  %v1310_v44 = vld [vmem:[%s4030_s10 + $0x20] sm:$0xff] }
 0x28d   : > { %2858 = vmatprep.subr.mxu0 %v3205_v11 }
 0x28f   : > { %2840 = vmatmul.mubr.msk.f32.vlgmr.msra.gmra.mxu0 %vm792_vm2, %v769_v41  ;;  %v1037_v45 = vpop.permute.xlu1 %1036 }
 0x290   : > { %2859 = vmatpush3.xpose.msk.msra.mxu0 %vm792_vm2, %v1037_v45  ;;  %2860 = vmatprep.mubr.msk.f32.mxu0 %vm3206_vm1, %v3205_v11  ;;  %v1309_v45 = vld [vmem:[%s4030_s10 + $0x18] sm:$0xff] }
 0x291   : > { %2868 = vmatprep.subr.mxu0 %v3205_v11 }
 0x293   : > { %2861 = vmatmul.mubr.msk.f32.vlgmr.msra.gmra.mxu0 %vm792_vm2, %v1035_v46  ;;  %v1308_v46 = vld [vmem:[%s4030_s10 + $0x10] sm:$0xff] }
 0x294   : > { %2876 = vmatprep.mubr.msk.f32.mxu0 %vm3206_vm1, %v3205_v11  ;;  %2869 = vmatpush3.msra.mxu0 %v780_v12  ;;  %v2648_v12 = vld [vmem:[%s4031_s11] ss:$0 sm:$0xff] }
 0x295   : > { %2870 = vmatprep.subr.mxu0 %v3205_v11 }
 0x296   : > { %2871 = vmatpush3.msra.mxu0 %v779_v19 }
 0x297   : > { %2872 = vmatprep.subr.mxu0 %v3205_v11 }
 0x298   : > { %2873 = vmatpush3.msra.mxu0 %v778_v20 }
 0x299   : > { %2874 = vmatprep.subr.mxu0 %v3205_v11 }
 0x29a   : > { %2875 = vmatpush3.msra.mxu0 %v777_v21 }
 0x29b   : > { %2898 = vmatprep.subr.mxu0 %v3205_v11 }
 0x34f   : > { %v863_v48 = vpop.f32.mrf.mxu0 }
 0x350   : > { %v867_v49 = vmul.f32 0.17677669, %v863_v48  ;;  %v1307_v48 = vld [vmem:[%s4030_s10 + $0x8] sm:$0xff] }
 0x351   : > { %v2841_v50 = vpop.f32.mrf.mxu0 }
 0x352   : > { %v874_v51 = vadd.f32 %v3468_v47, %v867_v49  ;;  %v1306_v49 = vld [vmem:[%s4030_s10] sm:$0xff] }
 0x353   : > { %v1108_v52 = vpop.f32.mrf.mxu0 }
 0x354   : > { %v1112_v53 = vmul.f32 0.17677669, %v1108_v52  ;;  %v876_v54 = vsel %vm875_vm3, %v874_v51, -inf }
 0x355   : > { %877 = vmax.xlane.f32.xlu1 %v876_v54  ;;  %v2862_v55 = vpop.f32.mrf.mxu0  ;;  %v2646_v54 = vld [vmem:[%s4028_s8] ss:$0 sm:$0xff] }
 0x356   : > { %v1113_v56 = vadd.f32 %v3468_v47, %v1112_v53 }
 0x358   : > { %v1114_v57 = vsel %vm875_vm3, %v1113_v56, -inf }
 0x359   : > { %1115 = vmax.xlane.f32.xlu1 %v1114_v57 }
 0x3de   : > { %v878_v58 = vpop.xlane.xlu1 %877 }
 0x3df   : > { %v879_v59 = vsub.f32 %v874_v51, %v878_v58 }
 0x3e1   : > { %v880_v60 = vmul.f32 1.442695, %v879_v59  ;;  %v1418_v59 = vld [vmem:[%s4032_s12 + $0x78] sm:$0xff] }
 0x3e2   : > { %v1116_v61 = vpop.xlane.xlu1 %1115 }
 0x3e3   : > { %3113 = vpow2.f32 %v880_v60  ;;  %v1117_v62 = vsub.f32 %v1113_v56, %v1116_v61  ;;  %v2647_v56 = vld [vmem:[%s4029_s9] ss:$0 sm:$0xff]  ;;  %v1417_v60 = vld [vmem:[%s4032_s12 + $0x70] sm:$0xff]  ;;  %v1416_v61 = vld [vmem:[%s4032_s12 + $0x68] sm:$0xff] }
 0x3e5   : > { %v1118_v63 = vmul.f32 1.442695, %v1117_v62  ;;  %v1415_v62 = vld [vmem:[%s4032_s12 + $0x60] sm:$0xff] }
 0x3e7   : > { %3115 = vpow2.f32 %v1118_v63  ;;  %v1414_v63 = vld [vmem:[%s4032_s12 + $0x58] sm:$0xff] }
 0x3f0   : > { %v3114_v0 = vpop.eup %3113 }
 0x3f1   : > { %v882_v1 = vsel %vm875_vm3, %v3114_v0, 0.0 }
 0x3f2   : > { %883 = vadd.xlane.f32.xlu0 %v882_v1  ;;  %v1412_v1 = vld [vmem:[%s4032_s12 + $0x48] sm:$0xff] }
 0x3f4   : > { %v3116_v2 = vpop.eup %3115 }
 0x3f5   : > { %v1120_v3 = vsel %vm875_vm3, %v3116_v2, 0.0 }
 0x3f6   : > { %1121 = vadd.xlane.f32.xlu1 %v1120_v3  ;;  %v1410_v3 = vld [vmem:[%s4032_s12 + $0x38] sm:$0xff] }
 0x407   : > { %1126 = vrot.lane.b32.xlu1 %v771_v43, %s4049_s1  ;;  %v1311_v43 = vld [vmem:[%s4030_s10 + $0x28] sm:$0xff]  ;;  %s4071_s1 = smov 32  }
 0x47b   : > { %v884_v4 = vpop.xlane.xlu0 %883 }
 0x47c   : > { %3117 = vrcp.f32 %v884_v4  ;;  %v1409_v4 = vld [vmem:[%s4032_s12 + $0x30] sm:$0xff] }
 0x47f   : > { %v1122_v13 = vpop.xlane.xlu1 %1121 }
 0x480   : > { %3119 = vrcp.f32 %v1122_v13 }
 0x483   : > { %v1127_v16 = vpop.permute.xlu1 %1126 }
 0x489   : > { %v3118_v5 = vpop.eup %3117 }
 0x48a   : > { %v886_v6 = vmul.f32 %v3118_v5, %v3114_v0  ;;  %v1413_v0 = vld [vmem:[%s4032_s12 + $0x50] sm:$0xff]  ;;  %v1408_v5 = vld [vmem:[%s4032_s12 + $0x28] sm:$0xff] }
 0x48c   : > { %2845 = vmatmul.mubr.msk.f32.vlgmr.msra.gmra.mxu1 %vm875_vm3, %v886_v6  ;;  %v1407_v6 = vld [vmem:[%s4032_s12 + $0x20] sm:$0xff] }
 0x48d   : > { %2848 = vmatpush3.msra.mxu1 %v776_v7  ;;  %2855 = vmatprep.mubr.msk.f32.mxu1 %vm3206_vm1, %v3205_v11  ;;  %v3120_v14 = vpop.eup %3119  ;;  %v1406_v7 = vld [vmem:[%s4032_s12 + $0x18] sm:$0xff] }
 0x48e   : > { %2849 = vmatprep.subr.mxu1 %v3205_v11  ;;  %v1124_v18 = vmul.f32 %v3120_v14, %v3116_v2  ;;  %v1411_v2 = vld [vmem:[%s4032_s12 + $0x40] sm:$0xff] }
 0x48f   : > { %2850 = vmatpush3.msra.mxu1 %v775_v8  ;;  %v1405_v8 = vld [vmem:[%s4032_s12 + $0x10] sm:$0xff] }
 0x490   : > { %2851 = vmatprep.subr.mxu1 %v3205_v11 }
 0x491   : > { %2852 = vmatpush3.msra.mxu1 %v774_v9  ;;  %v1404_v9 = vld [vmem:[%s4032_s12 + $0x8] sm:$0xff] }
 0x492   : > { %2853 = vmatprep.subr.mxu1 %v3205_v11 }
 0x493   : > { %2854 = vmatpush3.msra.mxu1 %v773_v10  ;;  %v1403_v10 = vld [vmem:[%s4032_s12] sm:$0xff] }
 0x494   : > { %2863 = vmatprep.subr.mxu1 %v3205_v11 }
 0x54c   : > { %v956_v15 = vpop.f32.mrf.mxu1 }
 0x54d   : > { %2856 = vmatmul.mubr.msk.f32.vlgmr.msra.gmra.mxu1 %vm792_vm2, %v956_v15 }
 0x54e   : > { %2864 = vmatpush3.msra.mxu1 %v1127_v16  ;;  %v2846_v17 = vpop.f32.mrf.mxu1  ;;  %2865 = vmatprep.mubr.msk.f32.mxu1 %vm3206_vm1, %v3205_v11 }
 0x54f   : > { %2879 = vmatprep.subr.mxu1 %v3205_v11 }
 0x551   : > { %2866 = vmatmul.mubr.msk.f32.vlgmr.msra.gmra.mxu1 %vm875_vm3, %v1124_v18 }
 0x552   : > { %2895 = vmatprep.mubr.msk.f32.mxu1 %vm3206_vm1, %v3205_v11  ;;  %2880 = vmatpush3.msra.mxu1 %v1313_v42  ;;  %v2666_v42 = vld [vmem:[%s4066_s3 + $0xe8] sm:$0xff] }
 0x553   : > { %2881 = vmatprep.subr.mxu1 %v3205_v11 }
 0x60d   : > { %v1029_v22 = vpop.f32.mrf.mxu1 }
 0x60e   : > { %v1033_v27 = vadd.f32 %v2636_v26, %v1029_v22 }
 0x60f   : > { %v2857_v23 = vpop.f32.mrf.mxu1 }
 0x611   : > { %v1198_v24 = vpop.f32.mrf.mxu1 }
 0x612   : > { %2877 = vmatmul.mubr.msk.f32.vlgmr.msra.gmra.mxu0 %vm792_vm2, %v1198_v24 }
 0x613   : > { %v2867_v25 = vpop.f32.mrf.mxu1  ;;  %2930 = vmatprep.mubr.msk.f32.mxu0 %vm3206_vm1, %v3205_v11  ;;  %2899 = vmatpush3.msra.mxu0 %v1418_v59 }
 0x614   : > { %2900 = vmatprep.subr.mxu0 %v3205_v11  ;;  %v2650_v25 = vld [vmem:[%s4033_s13] ss:$0 sm:$0xff] }
 0x615   : > { %2901 = vmatpush3.msra.mxu0 %v1417_v60  ;;  %v2651_v60 = vld [vmem:[%s4034_s14] ss:$0 sm:$0xff] }
 0x616   : > { %2902 = vmatprep.subr.mxu0 %v3205_v11 }
 0x617   : > { %2903 = vmatpush3.msra.mxu0 %v1416_v61 }
 0x618   : > { %2904 = vmatprep.subr.mxu0 %v3205_v11 }
 0x619   : > { %2905 = vmatpush3.msra.mxu0 %v1415_v62  ;;  %v2652_v62 = vld [vmem:[%s4035_s15] ss:$0 sm:$0xff] }
 0x61a   : > { %2906 = vmatprep.subr.mxu0 %v3205_v11 }
 0x61b   : > { %2907 = vmatpush3.msra.mxu0 %v1414_v63 }
 0x61c   : > { %2908 = vmatprep.subr.mxu0 %v3205_v11 }
 0x61d   : > { %2909 = vmatpush3.msra.mxu0 %v1413_v0 }
 0x61e   : > { %2910 = vmatprep.subr.mxu0 %v3205_v11 }
 0x61f   : > { %2911 = vmatpush3.msra.mxu0 %v1412_v1  ;;  %v2669_v1 = vld [vmem:[%s4025_s5 + $0x2] sm:$0x3] }
 0x620   : > { %2912 = vmatprep.subr.mxu0 %v3205_v11 }
 0x621   : > { %2913 = vmatpush3.msra.mxu0 %v1411_v2  ;;  %v1549_v2 = vrot.slane %v2669_v1, %v691_v35 }
 0x622   : > { %2914 = vmatprep.subr.mxu0 %v3205_v11 }
 0x623   : > { %2915 = vmatpush3.msra.mxu0 %v1410_v3 }
 0x624   : > { %2916 = vmatprep.subr.mxu0 %v3205_v11 }
 0x625   : > { %2917 = vmatpush3.msra.mxu0 %v1409_v4 }
 0x626   : > { %2918 = vmatprep.subr.mxu0 %v3205_v11 }
 0x627   : > { %2919 = vmatpush3.msra.mxu0 %v1408_v5  ;;  %v1553_v5 = vrot.slane %v2669_v1, %v695_v37 }
 0x628   : > { %2920 = vmatprep.subr.mxu0 %v3205_v11 }
 0x629   : > { %2921 = vmatpush3.msra.mxu0 %v1407_v6 }
 0x62a   : > { %2922 = vmatprep.subr.mxu0 %v3205_v11 }
 0x62b   : > { %2923 = vmatpush3.msra.mxu0 %v1406_v7 }
 0x62c   : > { %2924 = vmatprep.subr.mxu0 %v3205_v11 }
 0x62d   : > { %2925 = vmatpush3.msra.mxu0 %v1405_v8 }
 0x62e   : > { %2926 = vmatprep.subr.mxu0 %v3205_v11 }
 0x62f   : > { %2927 = vmatpush3.msra.mxu0 %v1404_v9 }
 0x630   : > { %2928 = vmatprep.subr.mxu0 %v3205_v11 }
 0x631   : > { %2929 = vmatpush3.msra.mxu0 %v1403_v10 }
 0x632   : > { %2943 = vmatprep.subr.mxu0 %v3205_v11 }
 0x6d2   : > { %v1271_v28 = vpop.f32.mrf.mxu0 }
 0x6d3   : > { %v1275_v29 = vadd.f32 %v1271_v28, %v1033_v27 }
 0x6d4   : > { %v2878_v30 = vpop.f32.mrf.mxu0 }
 0x6d5   : > { %v1276_v31 = vadd.f32 %v1275_v29, %v3431_v32  ;;  %v1312_v32 = vld [vmem:[%s4030_s10 + $0x30] sm:$0xff] }
 0x6d6   : > { %2882 = vmatpush3.msra.mxu1 %v1312_v32  ;;  %v2665_v32 = vld [vmem:[%s4066_s3 + $0xe0] sm:$0xff] }
 0x6d7   : > { %v1279_v33 = vsel %vm641_vm0, %v1276_v31, 0.0  ;;  %2883 = vmatprep.subr.mxu1 %v3205_v11 }
 0x6d8   : > { %1280 = vadd.xlane.f32.xlu0 %v1279_v33  ;;  %2884 = vmatpush3.msra.mxu1 %v1311_v43  ;;  %v2664_v43 = vld [vmem:[%s4066_s3 + $0xd8] sm:$0xff] }
 0x6d9   : > { %2885 = vmatprep.subr.mxu1 %v3205_v11 }
 0x6da   : > { %2886 = vmatpush3.msra.mxu1 %v1310_v44  ;;  %v2663_v44 = vld [vmem:[%s4066_s3 + $0xd0] sm:$0xff] }
 0x6db   : > { %2887 = vmatprep.subr.mxu1 %v3205_v11 }
 0x6dc   : > { %2888 = vmatpush3.msra.mxu1 %v1309_v45  ;;  %v2662_v45 = vld [vmem:[%s4066_s3 + $0xc8] sm:$0xff] }
 0x6dd   : > { %2889 = vmatprep.subr.mxu1 %v3205_v11 }
 0x6de   : > { %2890 = vmatpush3.msra.mxu1 %v1308_v46  ;;  %v2661_v46 = vld [vmem:[%s4066_s3 + $0xc0] sm:$0xff] }
 0x6df   : > { %2891 = vmatprep.subr.mxu1 %v3205_v11 }
 0x6e0   : > { %2892 = vmatpush3.msra.mxu1 %v1307_v48  ;;  %v2660_v48 = vld [vmem:[%s4066_s3 + $0xb8] sm:$0xff] }
 0x6e1   : > { %2893 = vmatprep.subr.mxu1 %v3205_v11 }
 0x6e2   : > { %2894 = vmatpush3.msra.mxu1 %v1306_v49  ;;  %v2659_v49 = vld [vmem:[%s4066_s3 + $0xb0] sm:$0xff] }
 0x761   : > { %v1281_v36 = vpop.xlane.xlu0 %1280 }
 0x762   : > { %v1282_v38 = vmul.f32 0.015625, %v1281_v36 }
 0x764   : > { %v1283_v39 = vsub.f32 %v1276_v31, %v1282_v38 }
 0x766   : > { %v1284_v40 = vmul.f32 %v1283_v39, %v1283_v39 }
 0x768   : > { %v1285_v41 = vsel %vm641_vm0, %v1284_v40, 0.0  ;;  %v2668_v40 = vld [vmem:[%s4066_s3 + $0xf8] sm:$0xff] }
 0x769   : > { %1286 = vadd.xlane.f32.xlu0 %v1285_v41  ;;  %1575 = vmatprep.subr.mxu1 %v2668_v40  ;;  %v2667_v41 = vld [vmem:[%s4066_s3 + $0xf0] sm:$0xff] }
 0x7f2   : > { %v1287_v50 = vpop.xlane.xlu0 %1286 }
 0x7f3   : > { %v1288_v51 = vmul.f32 0.015625, %v1287_v50  ;;  %v2658_v50 = vld [vmem:[%s4066_s3 + $0xa8] sm:$0xff] }
 0x7f5   : > { %v1289_v52 = vadd.f32 1e-12, %v1288_v51  ;;  %v2657_v51 = vld [vmem:[%s4066_s3 + $0xa0] sm:$0xff] }
 0x7f7   : > { %3121 = vrsqrt.f32 %v1289_v52  ;;  %v2656_v52 = vld [vmem:[%s4066_s3 + $0x98] sm:$0xff] }
 0x804   : > { %v3122_v53 = vpop.eup %3121 }
 0x805   : > { %v1291_v55 = vmul.f32 %v3122_v53, %v1283_v39  ;;  %v2655_v53 = vld [vmem:[%s4066_s3 + $0x90] sm:$0xff] }
 0x807   : > { %v1298_v57 = vmul.f32 %v2646_v54, %v1291_v55  ;;  %v2654_v54 = vld [vmem:[%s4066_s3 + $0x88] sm:$0xff]  ;;  %v2653_v55 = vld [vmem:[%s4066_s3 + $0x80] sm:$0xff] }
 0x809   : > { %v3565_v58 = vadd.f32 %v2647_v56, %v1298_v57 }
 0x80b   : > { %2896 = vmatmul.mubr.msk.f32.vlgmr.msra.gmra.mxu1 %vm641_vm0, %v3565_v58 }
 0x80c   : > { %1623 = vmatprep.mubr.f32.mxu1 %v3205_v11  ;;  %1576 = vmatpush1.msra.mxu1 %v2667_v41 }
 0x80d   : > { %1577 = vmatprep.subr.mxu1 %v2666_v42 }
 0x80e   : > { %1578 = vmatpush1.msra.mxu1 %v2665_v32 }
 0x80f   : > { %1579 = vmatprep.subr.mxu1 %v2664_v43  ;;  %v2677_v43 = vld [vmem:[%s4026_s6 + $0x70] sm:$0xff] }
 0x810   : > { %1580 = vmatpush1.msra.mxu1 %v2663_v44 }
 0x811   : > { %1581 = vmatprep.subr.mxu1 %v2662_v45  ;;  %v2676_v45 = vld [vmem:[%s4026_s6 + $0x68] sm:$0xff] }
 0x812   : > { %1582 = vmatpush1.msra.mxu1 %v2661_v46 }
 0x813   : > { %1583 = vmatprep.subr.mxu1 %v2660_v48 }
 0x814   : > { %1584 = vmatpush1.msra.mxu1 %v2659_v49 }
 0x815   : > { %1585 = vmatprep.subr.mxu1 %v2658_v50  ;;  %v2675_v50 = vld [vmem:[%s4026_s6 + $0x60] sm:$0xff] }
 0x816   : > { %1586 = vmatpush1.msra.mxu1 %v2657_v51 }
 0x817   : > { %1587 = vmatprep.subr.mxu1 %v2656_v52 }
 0x818   : > { %1588 = vmatpush1.msra.mxu1 %v2655_v53  ;;  %v2680_v53 = vld [vmem:[%s4027_s7 + $0x1] ss:$0 sm:$0xff] }
 0x819   : > { %1589 = vmatprep.subr.mxu1 %v2654_v54 }
 0x81a   : > { %1590 = vmatpush1.msra.mxu1 %v2653_v55 }
 0x81b   : > { %2933 = vmatprep.subr.mxu1 %v3205_v11 }
 0x8cb   : > { %v1390_v13 = vpop.f32.mrf.mxu1 }
 0x8cc   : > { %v1391_v14 = vadd.f32 %v2648_v12, %v1390_v13 }
 0x8cd   : > { %v2897_v15 = vpop.f32.mrf.mxu1 }
 0x8ce   : > { %v1394_v16 = vmul.f32 %v1391_v14, %v1391_v14 }
 0x8d0   : > { %v1395_v17 = vmul.f32 %v1394_v16, %v1391_v14 }
 0x8d2   : > { %v1396_v18 = vmul.f32 0.044715, %v1395_v17  ;;  %v2674_v17 = vld [vmem:[%s4026_s6 + $0x58] sm:$0xff] }
 0x8d4   : > { %v1397_v19 = vadd.f32 %v1396_v18, %v1391_v14  ;;  %v2673_v18 = vld [vmem:[%s4026_s6 + $0x50] sm:$0xff] }
 0x8d6   : > { %v1398_v20 = vmul.f32 0.7978846, %v1397_v19  ;;  %v2672_v19 = vld [vmem:[%s4026_s6 + $0x48] sm:$0xff] }
 0x8d8   : > { %3123 = vtanh.f32 %v1398_v20 }
 0x8e5   : > { %v3124_v21 = vpop.eup %3123 }
 0x8e6   : > { %v1400_v22 = vadd.f32 1.0, %v3124_v21 }
 0x8e8   : > { %v1401_v23 = vmul.f32 0.5, %v1400_v22 }
 0x8ea   : > { %v1402_v24 = vmul.f32 %v1401_v23, %v1391_v14 }
 0x8ec   : > { %2931 = vmatmul.mubr.f32.vlgmr.msra.gmra.mxu0 %v1402_v24 }
 0x8ed   : > { %2951 = vmatprep.mubr.msk.f32.mxu0 %vm3206_vm1, %v3205_v11  ;;  %2944 = vmatpush3.msra.mxu0 %v2674_v17  ;;  %v2718_v17 = vld [vmem:[%s4032_s12 + $0xf0] sm:$0xff] }
 0x8ee   : > { %2945 = vmatprep.subr.mxu0 %v3205_v11 }
 0x8ef   : > { %2946 = vmatpush3.msra.mxu0 %v2673_v18  ;;  %v2717_v18 = vld [vmem:[%s4032_s12 + $0xe8] sm:$0xff] }
 0x8f0   : > { %2947 = vmatprep.subr.mxu0 %v3205_v11 }
 0x8f1   : > { %2948 = vmatpush3.msra.mxu0 %v2672_v19  ;;  %v2716_v19 = vld [vmem:[%s4032_s12 + $0xe0] sm:$0xff] }
 0x8f2   : > { %2949 = vmatprep.subr.mxu0 %v3205_v11 }
 0x9ac   : > { %v1492_v26 = vpop.f32.mrf.mxu0 }
 0x9ad   : > { %v1493_v27 = vadd.f32 %v2650_v25, %v1492_v26  ;;  %v2671_v25 = vld [vmem:[%s4026_s6 + $0x40] sm:$0xff] }
 0x9ae   : > { %v2932_v28 = vpop.f32.mrf.mxu0  ;;  %2950 = vmatpush3.msra.mxu0 %v2671_v25  ;;  %v2710_v25 = vld [vmem:[%s4032_s12 + $0xb0] sm:$0xff] }
 0x9af   : > { %v1496_v29 = vadd.f32 %v1493_v27, %v3565_v58  ;;  %2964 = vmatprep.subr.mxu0 %v3205_v11 }
 0x9b1   : > { %v1499_v30 = vsel %vm641_vm0, %v1496_v29, 0.0 }
 0x9b2   : > { %1500 = vadd.xlane.f32.xlu0 %v1499_v30 }
 0xa3b   : > { %v1501_v31 = vpop.xlane.xlu0 %1500 }
 0xa3c   : > { %v1502_v33 = vmul.f32 0.015625, %v1501_v31 }
 0xa3e   : > { %v1503_v36 = vsub.f32 %v1496_v29, %v1502_v33 }
 0xa40   : > { %v1504_v38 = vmul.f32 %v1503_v36, %v1503_v36 }
 0xa42   : > { %v1505_v39 = vsel %vm641_vm0, %v1504_v38, 0.0 }
 0xa43   : > { %1506 = vadd.xlane.f32.xlu1 %v1505_v39 }
 0xacc   : > { %v1507_v56 = vpop.xlane.xlu1 %1506 }
 0xacd   : > { %v1508_v57 = vmul.f32 0.015625, %v1507_v56 }
 0xacf   : > { %v1509_v58 = vadd.f32 1e-12, %v1508_v57 }
 0xad1   : > { %3125 = vrsqrt.f32 %v1509_v58 }
 0xade   : > { %v3126_v59 = vpop.eup %3125 }
 0xadf   : > { %v1511_v61 = vmul.f32 %v3126_v59, %v1503_v36 }
 0xae1   : > { %v1518_v63 = vmul.f32 %v2651_v60, %v1511_v61 }
 0xae3   : > { %v3700_v0 = vadd.f32 %v2652_v62, %v1518_v63 }
 0xae5   : > { %2670 = vmatmul.mubr.msk.f32.vlgmr.msra.gmra.mxu1 %vm641_vm0, %v3700_v0 }
 0xae6   : > { %2935 = vmatprep.mubr.msk.f32.mxu1 %vm3206_vm1, %v3205_v11 }
 0xba5   : > { %v1625_v3 = vpop.f32.mrf.mxu1 }
 0xba6   : > { %v1626_v4 = vadd.f32 %v1625_v3, %v1549_v2  ;;  %v2700_v2 = vld [vmem:[%s4030_s10 + $0x78] sm:$0xff]  ;;  %v2698_v3 = vld [vmem:[%s4030_s10 + $0x68] sm:$0xff] }
 0xba7   : > { %v1627_v6 = vpop.f32.mrf.mxu1 }
 0xba8   : > { %1649 = vrot.lane.b32.xlu0 %v1626_v4, %s3208_s28  ;;  %v1628_v8 = vadd.f32 %v1627_v6, %v1553_v5  ;;  %s4070_s28 = smov 96   ;;  %v2696_v5 = vld [vmem:[%s4030_s10 + $0x58] sm:$0xff]  ;;  %v2695_v6 = vld [vmem:[%s4030_s10 + $0x50] sm:$0xff] }
 0xc1a   : > { %v1650_v7 = vpop.permute.xlu0 %1649 }
 0xc1b   : > { %2934 = vmatpush3.xpose.msk.msra.mxu1 %vm792_vm2, %v1650_v7  ;;  %v2694_v7 = vld [vmem:[%s4030_s10 + $0x48] sm:$0xff] }
 0xc1c   : > { %2938 = vmatprep.subr.mxu1 %v3205_v11 }
 0xc1e   : > { %2936 = vmatmul.mubr.msk.f32.vlgmr.msra.gmra.mxu1 %vm792_vm2, %v1626_v4 }
 0xc1f   : > { %2939 = vmatpush3.msra.mxu1 %v1628_v8  ;;  %2940 = vmatprep.mubr.msk.f32.mxu1 %vm3206_vm1, %v3205_v11 }
 0xc20   : > { %2954 = vmatprep.subr.mxu1 %v3205_v11 }
 0xcde   : > { %v1721_v35 = vpop.f32.mrf.mxu1 }
 0xcdf   : > { %v1725_v9 = vmul.f32 0.17677669, %v1721_v35 }
 0xce0   : > { %v2937_v10 = vpop.f32.mrf.mxu1 }
 0xce1   : > { %v1726_v34 = vadd.f32 %v3468_v47, %v1725_v9 }
 0xce3   : > { %v1727_v37 = vsel %vm875_vm3, %v1726_v34, -inf }
 0xce4   : > { %1728 = vmax.xlane.f32.xlu0 %v1727_v37  ;;  %v2691_v37 = vld [vmem:[%s4028_s8 + $0x1] ss:$0 sm:$0xff] }
 0xcfa   : > { %1885 = vrot.lane.b32.xlu0 %v1626_v4, %s4070_s28 }
 0xd6d   : > { %v1729_v12 = vpop.xlane.xlu0 %1728 }
 0xd6e   : > { %v1730_v13 = vsub.f32 %v1726_v34, %v1729_v12 }
 0xd70   : > { %v1731_v14 = vmul.f32 1.442695, %v1730_v13  ;;  %v2692_v13 = vld [vmem:[%s4029_s9 + $0x1] ss:$0 sm:$0xff] }
 0xd71   : > { %v1886_v24 = vpop.permute.xlu0 %1885 }
 0xd72   : > { %3127 = vpow2.f32 %v1731_v14 }
 0xd7f   : > { %v3128_v15 = vpop.eup %3127 }
 0xd80   : > { %v1733_v16 = vsel %vm875_vm3, %v3128_v15, 0.0 }
 0xd81   : > { %1734 = vadd.xlane.f32.xlu1 %v1733_v16  ;;  %v2719_v16 = vld [vmem:[%s4032_s12 + $0xf8] sm:$0xff] }
 0xd92   : > { %1887 = vrot.lane.b32.xlu1 %v1626_v4, %s4071_s1  ;;  %v2697_v4 = vld [vmem:[%s4030_s10 + $0x60] sm:$0xff] }
 0xe0a   : > { %v1735_v20 = vpop.xlane.xlu1 %1734 }
 0xe0b   : > { %3129 = vrcp.f32 %v1735_v20  ;;  %v2715_v20 = vld [vmem:[%s4032_s12 + $0xd8] sm:$0xff] }
 0xe0e   : > { %v1888_v23 = vpop.permute.xlu1 %1887 }
 0xe18   : > { %v3130_v21 = vpop.eup %3129 }
 0xe19   : > { %v1737_v22 = vmul.f32 %v3130_v21, %v3128_v15  ;;  %v2714_v21 = vld [vmem:[%s4032_s12 + $0xd0] sm:$0xff] }
 0xe1b   : > { %2941 = vmatmul.mubr.msk.f32.vlgmr.msra.gmra.mxu1 %vm875_vm3, %v1737_v22  ;;  %v2713_v22 = vld [vmem:[%s4032_s12 + $0xc8] sm:$0xff] }
 0xe1c   : > { %2955 = vmatpush3.xpose.msk.msra.mxu1 %vm792_vm2, %v1888_v23  ;;  %2956 = vmatprep.mubr.msk.f32.mxu1 %vm3206_vm1, %v3205_v11  ;;  %v2712_v23 = vld [vmem:[%s4032_s12 + $0xc0] sm:$0xff] }
 0xe1d   : > { %2959 = vmatprep.subr.mxu1 %v3205_v11 }
 0xe1f   : > { %2957 = vmatmul.mubr.msk.f32.vlgmr.msra.gmra.mxu1 %vm792_vm2, %v1886_v24  ;;  %v2711_v24 = vld [vmem:[%s4032_s12 + $0xb8] sm:$0xff] }
 0xe20   : > { %2961 = vmatprep.mubr.msk.f32.mxu1 %vm3206_vm1, %v3205_v11 }
 0xedb   : > { %v1807_v26 = vpop.f32.mrf.mxu1 }
 0xedc   : > { %2952 = vmatmul.mubr.msk.f32.vlgmr.msra.gmra.mxu0 %vm792_vm2, %v1807_v26  ;;  %v2709_v26 = vld [vmem:[%s4032_s12 + $0xa8] sm:$0xff] }
 0xedd   : > { %v2942_v27 = vpop.f32.mrf.mxu1  ;;  %2972 = vmatprep.mubr.msk.f32.mxu0 %vm3206_vm1, %v3205_v11 }
 0xede   : > { %v2708_v27 = vld [vmem:[%s4032_s12 + $0xa0] sm:$0xff] }
 0xedf   : > { %v1959_v28 = vpop.f32.mrf.mxu1 }
 0xee0   : > { %v1963_v29 = vmul.f32 0.17677669, %v1959_v28  ;;  %v2707_v28 = vld [vmem:[%s4032_s12 + $0x98] sm:$0xff] }
 0xee1   : > { %v2958_v30 = vpop.f32.mrf.mxu1 }
 0xee2   : > { %v1964_v31 = vadd.f32 %v3468_v47, %v1963_v29  ;;  %v2678_v47 = vld [vmem:[%s4026_s6 + $0x78] sm:$0xff]  ;;  %v2706_v29 = vld [vmem:[%s4032_s12 + $0x90] sm:$0xff]  ;;  %v2705_v30 = vld [vmem:[%s4032_s12 + $0x88] sm:$0xff] }
 0xee3   : > { %2965 = vmatpush3.msra.mxu0 %v2678_v47 }
 0xee4   : > { %v1965_v33 = vsel %vm875_vm3, %v1964_v31, -inf  ;;  %2966 = vmatprep.subr.mxu0 %v3205_v11 }
 0xee5   : > { %1966 = vmax.xlane.f32.xlu1 %v1965_v33  ;;  %2967 = vmatpush3.msra.mxu0 %v2677_v43  ;;  %v2702_v33 = vld [vmem:[%s4031_s11 + $0x1] ss:$0 sm:$0xff] }
 0xee6   : > { %2968 = vmatprep.subr.mxu0 %v3205_v11 }
 0xee7   : > { %2969 = vmatpush3.msra.mxu0 %v2676_v45 }
 0xee8   : > { %2970 = vmatprep.subr.mxu0 %v3205_v11 }
 0xee9   : > { %2971 = vmatpush3.msra.mxu0 %v2675_v50 }
 0xeea   : > { %2994 = vmatprep.subr.mxu0 %v3205_v11 }
 0xef6   : > { %1977 = vrot.lane.b32.xlu1 %v1628_v8, %s4070_s28  ;;  %v2693_v8 = vld [vmem:[%s4030_s10 + $0x40] sm:$0xff]  ;;  %s3143_s28 = scalar_lea.vmem %s2565_s30, 16 }
 0xef7   : > { %p3144_p11 = scmp.ne.s32.totalorder %s2565_s30, %s3143_s28  ;;  %p3151_p1 = scmp.lt.s32.totalorder %s3149_s21, %s3143_s28 }
 0xef9   : > { %p3145_p12 = pnand %p3144_p11, %p3354_p5  ;;  %p3152_p2 = por %p3151_p1, %p3150_p0 }
 0xefb   : > { %p3146_p13 = pneg %p3145_p12 }
 0xefd   : > { %p3153_p3 = pnand %p3152_p2, %p3146_p13 }
 0xf6e   : > { %v1967_v36 = vpop.xlane.xlu1 %1966 }
 0xf6f   : > { %v1968_v38 = vsub.f32 %v1964_v31, %v1967_v36  ;;  %v2704_v31 = vld [vmem:[%s4032_s12 + $0x80] sm:$0xff] }
 0xf71   : > { %v1969_v39 = vmul.f32 1.442695, %v1968_v38 }
 0xf72   : > { %v1978_v40 = vpop.permute.xlu1 %1977 }
 0xf73   : > { %3131 = vpow2.f32 %v1969_v39  ;;  %2960 = vmatpush3.msra.mxu1 %v1978_v40 }
 0xf74   : > { %2975 = vmatprep.subr.mxu1 %v3205_v11 }
 0xf80   : > { %v3132_v41 = vpop.eup %3131 }
 0xf81   : > { %v1971_v42 = vsel %vm875_vm3, %v3132_v41, 0.0 }
 0xf82   : > { %1972 = vadd.xlane.f32.xlu0 %v1971_v42 }
 0xf9c   : > { %v1880_v32 = vpop.f32.mrf.mxu0 }
 0xf9d   : > { %v1884_v54 = vadd.f32 %v2680_v53, %v1880_v32 }
 0xf9e   : > { %v2953_v44 = vpop.f32.mrf.mxu0 }
0x100b   : > { %v1973_v46 = vpop.xlane.xlu0 %1972 }
0x100c   : > { %3133 = vrcp.f32 %v1973_v46 }
0x1019   : > { %v3134_v48 = vpop.eup %3133 }
0x101a   : > { %v1975_v49 = vmul.f32 %v3134_v48, %v3132_v41  ;;  %v2721_v48 = vld [vmem:[%s4033_s13 + $0x1] ss:$0 sm:$0xff] }
0x101c   : > { %2962 = vmatmul.mubr.msk.f32.vlgmr.msra.gmra.mxu1 %vm875_vm3, %v1975_v49 }
0x101d   : > { %2991 = vmatprep.mubr.msk.f32.mxu1 %vm3206_vm1, %v3205_v11  ;;  %2976 = vmatpush3.msra.mxu1 %v2700_v2  ;;  %v2386_v2 = vld [vmem:[%s4036_s16 + $0x8] sm:$0xff] }
0x101e   : > { %2977 = vmatprep.subr.mxu1 %v3205_v11 }
0x10dc   : > { %v2049_v51 = vpop.f32.mrf.mxu1 }
0x10dd   : > { %2973 = vmatmul.mubr.msk.f32.vlgmr.msra.gmra.mxu0 %vm792_vm2, %v2049_v51 }
0x10de   : > { %v2963_v52 = vpop.f32.mrf.mxu1  ;;  %3026 = vmatprep.mubr.msk.f32.mxu0 %vm3206_vm1, %v3205_v11  ;;  %2995 = vmatpush3.msra.mxu0 %v2719_v16  ;;  %v2469_v16 = vld [vmem:[%s4038_s18 + $0x8] sm:$0xff] }
0x10df   : > { %2996 = vmatprep.subr.mxu0 %v3205_v11 }
0x10e0   : > { %2997 = vmatpush3.msra.mxu0 %v2718_v17  ;;  %v2468_v17 = vld [vmem:[%s4038_s18] sm:$0xff] }
0x10e1   : > { %2998 = vmatprep.subr.mxu0 %v3205_v11 }
0x10e2   : > { %2999 = vmatpush3.msra.mxu0 %v2717_v18  ;;  %v2393_v18 = vld [vmem:[%s4037_s17] sm:$0x1] }
0x10e3   : > { %3000 = vmatprep.subr.mxu0 %v3205_v11 }
0x10e4   : > { %3001 = vmatpush3.msra.mxu0 %v2716_v19 }
0x10e5   : > { %3002 = vmatprep.subr.mxu0 %v3205_v11 }
0x10e6   : > { %3003 = vmatpush3.msra.mxu0 %v2715_v20 }
0x10e7   : > { %3004 = vmatprep.subr.mxu0 %v3205_v11 }
0x10e8   : > { %3005 = vmatpush3.msra.mxu0 %v2714_v21 }
0x10e9   : > { %3006 = vmatprep.subr.mxu0 %v3205_v11 }
0x10ea   : > { %3007 = vmatpush3.msra.mxu0 %v2713_v22 }
0x10eb   : > { %3008 = vmatprep.subr.mxu0 %v3205_v11 }
0x10ec   : > { %3009 = vmatpush3.msra.mxu0 %v2712_v23  ;;  %v2476_v23 = vld [vmem:[%s4039_s19] sm:$0x1] }
0x10ed   : > { %3010 = vmatprep.subr.mxu0 %v3205_v11 }
0x10ee   : > { %3011 = vmatpush3.msra.mxu0 %v2711_v24 }
0x10ef   : > { %3012 = vmatprep.subr.mxu0 %v3205_v11 }
0x10f0   : > { %3013 = vmatpush3.msra.mxu0 %v2710_v25 }
0x10f1   : > { %3014 = vmatprep.subr.mxu0 %v3205_v11 }
0x10f2   : > { %3015 = vmatpush3.msra.mxu0 %v2709_v26 }
0x10f3   : > { %3016 = vmatprep.subr.mxu0 %v3205_v11 }
0x10f4   : > { %3017 = vmatpush3.msra.mxu0 %v2708_v27 }
0x10f5   : > { %3018 = vmatprep.subr.mxu0 %v3205_v11 }
0x10f6   : > { %3019 = vmatpush3.msra.mxu0 %v2707_v28 }
0x10f7   : > { %3020 = vmatprep.subr.mxu0 %v3205_v11 }
0x10f8   : > { %3021 = vmatpush3.msra.mxu0 %v2706_v29 }
0x10f9   : > { %3022 = vmatprep.subr.mxu0 %v3205_v11 }
0x10fa   : > { %3023 = vmatpush3.msra.mxu0 %v2705_v30 }
0x10fb   : > { %3024 = vmatprep.subr.mxu0 %v3205_v11 }
0x10fc   : > { %3025 = vmatpush3.msra.mxu0 %v2704_v31 }
0x119d   : > { %v2122_v55 = vpop.f32.mrf.mxu0 }
0x119e   : > { %v2126_v56 = vadd.f32 %v2122_v55, %v1884_v54 }
0x119f   : > { %v2974_v57 = vpop.f32.mrf.mxu0 }
0x11a0   : > { %v2127_v58 = vadd.f32 %v2126_v56, %v3700_v0  ;;  %v2699_v0 = vld [vmem:[%s4030_s10 + $0x70] sm:$0xff] }
0x11a1   : > { %2978 = vmatpush3.msra.mxu1 %v2699_v0  ;;  %v2385_v0 = vld [vmem:[%s4036_s16] sm:$0xff] }
0x11a2   : > { %v2132_v59 = vsel %vm641_vm0, %v2127_v58, 0.0  ;;  %2979 = vmatprep.subr.mxu1 %v3205_v11 }
0x11a3   : > { %2133 = vadd.xlane.f32.xlu0 %v2132_v59  ;;  %2980 = vmatpush3.msra.mxu1 %v2698_v3  ;;  %v2392_v59 = vld [vmem:[%s4036_s16 + $0x38] sm:$0xff] }
0x11a4   : > { %2981 = vmatprep.subr.mxu1 %v3205_v11 }
0x11a5   : > { %2982 = vmatpush3.msra.mxu1 %v2697_v4 }
0x11a6   : > { %2983 = vmatprep.subr.mxu1 %v3205_v11 }
0x11a7   : > { %2984 = vmatpush3.msra.mxu1 %v2696_v5 }
0x11a8   : > { %2985 = vmatprep.subr.mxu1 %v3205_v11 }
0x11a9   : > { %2986 = vmatpush3.msra.mxu1 %v2695_v6 }
0x11aa   : > { %2987 = vmatprep.subr.mxu1 %v3205_v11 }
0x11ab   : > { %2988 = vmatpush3.msra.mxu1 %v2694_v7  ;;  %v2724_v7 = vld [vmem:[%s4034_s14 + $0x1] ss:$0 sm:$0xff] }
0x11ac   : > { %2989 = vmatprep.subr.mxu1 %v3205_v11 }
0x11ad   : > { %2990 = vmatpush3.msra.mxu1 %v2693_v8 }
0x11ae   : > { %3029 = vmatprep.subr.mxu1 %v3205_v11 }
0x122c   : > { %v2134_v60 = vpop.xlane.xlu0 %2133 }
0x122d   : > { %v2135_v61 = vmul.f32 0.015625, %v2134_v60  ;;  %v2391_v60 = vld [vmem:[%s4036_s16 + $0x30] sm:$0xff] }
0x122f   : > { %v2136_v62 = vsub.f32 %v2127_v58, %v2135_v61  ;;  %v2390_v61 = vld [vmem:[%s4036_s16 + $0x28] sm:$0xff] }
0x1231   : > { %v2137_v63 = vmul.f32 %v2136_v62, %v2136_v62 }
0x1233   : > { %v2138_v1 = vsel %vm641_vm0, %v2137_v63, 0.0  ;;  %v2388_v63 = vld [vmem:[%s4036_s16 + $0x18] sm:$0xff] }
0x1234   : > { %2139 = vadd.xlane.f32.xlu1 %v2138_v1  ;;  %v2387_v1 = vld [vmem:[%s4036_s16 + $0x10] sm:$0xff] }
0x12bd   : > { %v2140_v35 = vpop.xlane.xlu1 %2139 }
0x12be   : > { %v2141_v9 = vmul.f32 0.015625, %v2140_v35  ;;  %v2725_v35 = vld [vmem:[%s4035_s15 + $0x1] ss:$0 sm:$0xff] }
0x12c0   : > { %v2142_v10 = vadd.f32 1e-12, %v2141_v9 }
0x12c2   : > { %3135 = vrsqrt.f32 %v2142_v10 }
0x12cf   : > { %v3136_v34 = vpop.eup %3135 }
0x12d0   : > { %v2144_v12 = vmul.f32 %v3136_v34, %v2136_v62  ;;  %v2389_v62 = vld [vmem:[%s4036_s16 + $0x20] sm:$0xff]  ;;  %v2475_v34 = vld [vmem:[%s4038_s18 + $0x38] sm:$0xff] }
0x12d2   : > { %v2151_v14 = vmul.f32 %v2691_v37, %v2144_v12  ;;  %v2474_v37 = vld [vmem:[%s4038_s18 + $0x30] sm:$0xff]  ;;  %v2473_v12 = vld [vmem:[%s4038_s18 + $0x28] sm:$0xff] }
0x12d4   : > { %v3823_v15 = vadd.f32 %v2692_v13, %v2151_v14  ;;  %v2472_v13 = vld [vmem:[%s4038_s18 + $0x20] sm:$0xff]  ;;  %v2471_v14 = vld [vmem:[%s4038_s18 + $0x18] sm:$0xff] }
0x12d6   : > { %2992 = vmatmul.mubr.msk.f32.vlgmr.msra.gmra.mxu1 %vm641_vm0, %v3823_v15 }
0x12d7   : > { %3045 = vmatprep.mubr.msk.f32.mxu1 %vm3206_vm1, %v3205_v11  ;;  %3030 = vmatpush3.msra.mxu1 %v2392_v59 }
0x12d8   : > { %3031 = vmatprep.subr.mxu1 %v3205_v11 }
0x12d9   : > { %3032 = vmatpush3.msra.mxu1 %v2391_v60 }
0x12da   : > { %3033 = vmatprep.subr.mxu1 %v3205_v11 }
0x12db   : > { %3034 = vmatpush3.msra.mxu1 %v2390_v61 }
0x12dc   : > { %3035 = vmatprep.subr.mxu1 %v3205_v11 }
0x12dd   : > { %3036 = vmatpush3.msra.mxu1 %v2389_v62 }
0x12de   : > { %3037 = vmatprep.subr.mxu1 %v3205_v11 }
0x12df   : > { %3038 = vmatpush3.msra.mxu1 %v2388_v63 }
0x12e0   : > { %3039 = vmatprep.subr.mxu1 %v3205_v11 }
0x12e1   : > { %3040 = vmatpush3.msra.mxu1 %v2387_v1 }
0x12e2   : > { %3041 = vmatprep.subr.mxu1 %v3205_v11 }
0x12e3   : > { %3042 = vmatpush3.msra.mxu1 %v2386_v2 }
0x12e4   : > { %3043 = vmatprep.subr.mxu1 %v3205_v11 }
0x12e5   : > { %3044 = vmatpush3.msra.mxu1 %v2385_v0 }
0x12e6   : > { %3048 = vmatprep.subr.mxu1 %v3205_v11 }
0x1396   : > { %v2245_v36 = vpop.f32.mrf.mxu1 }
0x1397   : > { %v2246_v38 = vadd.f32 %v2702_v33, %v2245_v36 }
0x1398   : > { %v2993_v39 = vpop.f32.mrf.mxu1 }
0x1399   : > { %v2249_v40 = vmul.f32 %v2246_v38, %v2246_v38 }
0x139b   : > { %v2250_v41 = vmul.f32 %v2249_v40, %v2246_v38 }
0x139d   : > { %v2251_v42 = vmul.f32 0.044715, %v2250_v41 }
0x139f   : > { %v2252_v32 = vadd.f32 %v2251_v42, %v2246_v38 }
0x13a1   : > { %v2253_v47 = vmul.f32 0.7978846, %v2252_v32 }
0x13a3   : > { %3137 = vtanh.f32 %v2253_v47 }
0x13b0   : > { %v3138_v43 = vpop.eup %3137 }
0x13b1   : > { %v2255_v44 = vadd.f32 1.0, %v3138_v43 }
0x13b3   : > { %v2256_v45 = vmul.f32 0.5, %v2255_v44 }
0x13b5   : > { %v2257_v46 = vmul.f32 %v2256_v45, %v2246_v38 }
0x13b7   : > { %3027 = vmatmul.mubr.f32.vlgmr.msra.gmra.mxu0 %v2257_v46 }
0x1477   : > { %v2349_v49 = vpop.f32.mrf.mxu0 }
0x1478   : > { %v2350_v50 = vadd.f32 %v2721_v48, %v2349_v49 }
0x1479   : > { %v3028_v51 = vpop.f32.mrf.mxu0 }
0x147a   : > { %v2353_v52 = vadd.f32 %v2350_v50, %v3823_v15  ;;  %v2470_v15 = vld [vmem:[%s4038_s18 + $0x10] sm:$0xff] }
0x147c   : > { %v2358_v53 = vsel %vm641_vm0, %v2353_v52, 0.0 }
0x147d   : > { %2359 = vadd.xlane.f32.xlu0 %v2358_v53 }
0x1506   : > { %v2360_v54 = vpop.xlane.xlu0 %2359 }
0x1507   : > { %v2361_v55 = vmul.f32 0.015625, %v2360_v54 }
0x1509   : > { %v2362_v56 = vsub.f32 %v2353_v52, %v2361_v55 }
0x150b   : > { %v2363_v57 = vmul.f32 %v2362_v56, %v2362_v56 }
0x150d   : > { %v2364_v58 = vsel %vm641_vm0, %v2363_v57, 0.0 }
0x150e   : > { %2365 = vadd.xlane.f32.xlu0 %v2364_v58 }
0x1597   : > { %v2366_v3 = vpop.xlane.xlu0 %2365 }
0x1598   : > { %v2367_v4 = vmul.f32 0.015625, %v2366_v3 }
0x159a   : > { %v2368_v5 = vadd.f32 1e-12, %v2367_v4 }
0x159c   : > { %3139 = vrsqrt.f32 %v2368_v5 }
0x15a9   : > { %v3140_v6 = vpop.eup %3139 }
0x15aa   : > { %v2370_v8 = vmul.f32 %v3140_v6, %v2362_v56 }
0x15ac   : > { %v2377_v9 = vmul.f32 %v2724_v7, %v2370_v8 }
0x15ae   : > { %v2384_v10 = vadd.f32 %v2725_v35, %v2377_v9 }
0x15b0   : > { %3046 = vmatmul.mubr.msk.f32.vlgmr.msra.gmra.mxu1 %vm641_vm0, %v2384_v10 }
0x15b1   : > { %3064 = vmatprep.mubr.msk.f32.mxu1 %vm3206_vm1, %v3205_v11  ;;  %3049 = vmatpush3.msra.mxu1 %v2475_v34 }
0x15b2   : > { %3050 = vmatprep.subr.mxu1 %v3205_v11 }
0x15b3   : > { %3051 = vmatpush3.msra.mxu1 %v2474_v37 }
0x15b4   : > { %3052 = vmatprep.subr.mxu1 %v3205_v11 }
0x15b5   : > { %3053 = vmatpush3.msra.mxu1 %v2473_v12 }
0x15b6   : > { %3054 = vmatprep.subr.mxu1 %v3205_v11 }
0x15b7   : > { %3055 = vmatpush3.msra.mxu1 %v2472_v13 }
0x15b8   : > { %3056 = vmatprep.subr.mxu1 %v3205_v11 }
0x15b9   : > { %3057 = vmatpush3.msra.mxu1 %v2471_v14 }
0x15ba   : > { %3058 = vmatprep.subr.mxu1 %v3205_v11 }
0x15bb   : > { %3059 = vmatpush3.msra.mxu1 %v2470_v15 }
0x15bc   : > { %3060 = vmatprep.subr.mxu1 %v3205_v11 }
0x15bd   : > { %3061 = vmatpush3.msra.mxu1 %v2469_v16 }
0x15be   : > { %3062 = vmatprep.subr.mxu1 %v3205_v11 }
0x15bf   : > { %3063 = vmatpush3.msra.mxu1 %v2468_v17 }
0x1670   : > { %v2463_v19 = vpop.f32.mrf.mxu1 }
0x1671   : > { %v2464_v20 = vadd.f32 %v2463_v19, %v2393_v18 }
0x1672   : > { %v3047_v21 = vpop.f32.mrf.mxu1 }
0x1673   : > { %3141 = vtanh.f32 %v2464_v20 }
0x1680   : > { %v3142_v22 = vpop.eup %3141 }
0x1681   : > { %3065 = vmatmul.mubr.msk.f32.vlgmr.msra.gmra.mxu1 %vm641_vm0, %v3142_v22 }
0x1741   : > { %v2546_v11 = vpop.f32.mrf.mxu1 }
0x1742   : > { %v2547_v24 = vadd.f32 %v2546_v11, %v2476_v23 }
0x1743   : > { %v3066_v25 = vpop.f32.mrf.mxu1 }
0x1744   : > { %2550 = vst [vmem:[%s630_s26] sm:$0x1] %v2547_v24 }
0x1745   : > { %3156 = shalt.err (!%p3153_p3)
}
0x1746   : > { %s3157_s25 = scalar_lea.hbm %s3985_s29, 16  ;;  %s3161_s27 = scalar_lea.hbm %s4040_s20, 32 }
0x1747   : > { %p3158_p4 = scmp.ne.s32.totalorder %s3985_s29, %s3157_s25  ;;  %p3162_p9 = scmp.lt.s32.totalorder %s3985_s29, %s4040_s20 }
0x1748   : > { %p3163_p10 = scmp.lt.s32.totalorder %s3161_s27, %s3157_s25 }
0x1749   : > { %p3159_p7 = pnand %p3158_p4, %p3354_p5 }
0x174a   : > { %p3164_p11 = por %p3163_p10, %p3162_p9 }
0x174b   : > { %p3160_p8 = pneg %p3159_p7 }
0x174d   : > { %p3165_p12 = pnand %p3164_p11, %p3160_p8 }
0x174f   : > { %3168 = shalt.err (!%p3165_p12)
}
0x1750   : > { %3067 = dma.vmem_to_hbm [thread:$0]  (%p3354_p5), %s2565_s30, 16, %s3985_s29, %s2552_s24  }
0x1751 PF: > { %s4072_s28 = sld [smem:[#allocation7_spill]] }
0x1752   : > { %s4073_s2 = sld [smem:[#allocation5_spill]] }
0x1757   : > { %p3073_p13 = scmp.ge.s32.totalorder %s4072_s28, 2 }
0x1758   : > { %s2576_s3 = sand.u32 1, %s4073_s2  }
0x1759   : > { %p3070_p0 = pnand %p3073_p13, %p3358_p6  ;;  %s2577_s23 = scalar_lea.sflag [#allocation3], %s2576_s3 }
0x175b   : > { %p3071_p1 = pneg %p3070_p0 }
0x175d   : > { %3186 = dma.done.wait (%p3071_p1), %s2577_s23, 16  }
0x175e   : > { %3188 = vsyncadd (%p3071_p1), %s2577_s23, 4294967280  ;;  %s4075_s24 = sld [smem:[#allocation8_spill]]  ;;  %s4078_s1 = smov %s3195_s22 }
0x175f   : > { %s4076_s25 = sld [smem:[#allocation6_spill]] }
0x1760   : > { %s4077_s23 = sld [smem:[#allocation9_spill]] }
0x1764   : > { %p30_p2 = scmp.ge.s32.totalorder %s4075_s24, 4  }
0x1765   : > { %s4079_s22 = smov %s4076_s25 }
0x1766   :  { %32 = sbr.rel (!%p30_p2) target bundleno = 9 (0x9), region = 150 }
0x176b   :  { %2581 = vsyncpa [#allocation3], 1 }
0x176c   :  { %2583 = vsyncpa [#allocation3 + $0x1], 1 }

</bundles_post_ra>
